<compile_context>
chip_gen: v7x
topology: tpu7x:2x2x1
jax: 0.10.0
libtpu: 0.0.40
codegen_flags: <defaults>
</compile_context>

<pallas_src>
import math

import jax
import jax.numpy as jnp
from jax.experimental import pallas as pl
from jax.experimental.pallas import tpu as pltpu

# small, consistent hyper-parameters (module exposes n_embd / n_head as ctor args)
B = 2            # batch
T = 16           # sequence length (<= block_size)
C = 128          # n_embd
H = 4            # n_head
HS = C // H      # head_size
HID = 4 * C      # FFN hidden
NT = B * T       # folded token count (rows seen by the kernel)
LN_EPS = 1e-5
NEG_INF = -1e30  # finite "masked" value (robust even if a row were fully masked)


def transformer_block_kernel(
    x_ref,            # (NT, C)   f32
    vec_ref,          # (6, C)    f32: ln1g, ln1b, bo, ln2g, ln2b, b2
    maskb_ref,        # (NT, NT)  f32 additive causal bias (0 / -1e30)
    wqkv_ref,         # (C, 3C)   bf16, scale folded into Q columns
    wo_ref,           # (C, C)    bf16
    w1_ref,           # (C, HID)  bf16
    b1_ref,           # (1, HID)  f32
    w2_ref,           # (HID, C)  bf16
    o_ref,            # (NT, C)   f32
):
    x = x_ref[...]                                            # (NT, C) f32

    ln1g = vec_ref[0:1, :]
    ln1b = vec_ref[1:2, :]
    bo = vec_ref[2:3, :]
    ln2g = vec_ref[3:4, :]
    ln2b = vec_ref[4:5, :]
    b2 = vec_ref[5:6, :]

    def layer_norm(z, g, b):
        # mean and mean-of-squares are independent reductions (single pass)
        mu = jnp.mean(z, axis=-1, keepdims=True)
        ms = jnp.mean(z * z, axis=-1, keepdims=True)
        var = ms - mu * mu
        return (z - mu) * jax.lax.rsqrt(var + LN_EPS) * g + b

    # ---------------- LayerNorm 1 + fused QKV projection ----------------
    xn = layer_norm(x, ln1g, ln1b)
    qkv = jnp.dot(xn.astype(jnp.bfloat16), wqkv_ref[...],
                  preferred_element_type=jnp.float32)         # (NT, 3C) f32
    # 1/sqrt(HS) already folded into the Q columns of wqkv (wrapper).
    q = qkv[:, 0 * C:1 * C]
    k = qkv[:, 1 * C:2 * C]
    v = qkv[:, 2 * C:3 * C]

    def to_heads(m):                                          # (NT, C) -> (H, NT, HS)
        return jnp.transpose(m.reshape(NT, H, HS), (1, 0, 2))

    qh = to_heads(q).astype(jnp.bfloat16)
    kh = to_heads(k).astype(jnp.bfloat16)
    vh = to_heads(v).astype(jnp.bfloat16)

    # ---------------- causal multi-head attention ----------------
    logits = jnp.einsum("hnd,hmd->hnm", qh, kh,
                        preferred_element_type=jnp.float32)   # (H, NT, NT) f32
    logits = logits + maskb_ref[...][None, :, :]              # additive causal bias

    m_max = jnp.max(logits, axis=-1, keepdims=True)
    p = jnp.exp(logits - m_max)
    wei = p * pl.reciprocal(jnp.sum(p, axis=-1, keepdims=True), approx=True)
    # (dropout on wei is identity in eval mode)

    oh = jnp.einsum("hnm,hmd->hnd", wei.astype(jnp.bfloat16), vh,
                    preferred_element_type=jnp.float32)       # (H, NT, HS) f32
    attn = jnp.transpose(oh, (1, 0, 2)).reshape(NT, C)        # (NT, C)

    sa = jnp.dot(attn.astype(jnp.bfloat16), wo_ref[...],
                 preferred_element_type=jnp.float32) + bo
    x1 = x + sa                                               # residual 1

    # ---------------- LayerNorm 2 + FeedForward ----------------
    x2n = layer_norm(x1, ln2g, ln2b)
    hid = jnp.dot(x2n.astype(jnp.bfloat16), w1_ref[...],
                  preferred_element_type=jnp.float32) + b1_ref[...]
    hid = jnp.maximum(hid, 0.0)                               # ReLU
    ff = jnp.dot(hid.astype(jnp.bfloat16), w2_ref[...],
                 preferred_element_type=jnp.float32) + b2
    # (final dropout is identity in eval mode)

    o_ref[...] = (x1 + ff).astype(o_ref.dtype)                # residual 2


def prepare_params(params):
    """One-time weight prep (run at parameter init, NOT per forward call)."""
    (ln1g, ln1b, wq, wk, wv, wo, bo, ln2g, ln2b, w1, b1, w2, b2) = params
    scale = 1.0 / math.sqrt(HS)
    # Fused QKV weight with the attention scale folded into the Q columns.
    wqkv = jnp.concatenate([wq * scale, wk, wv], axis=1).astype(jnp.bfloat16)
    wo_b = wo.astype(jnp.bfloat16)
    w1_b = w1.astype(jnp.bfloat16)
    w2_b = w2.astype(jnp.bfloat16)
    # Pack all (1, C) vectors into a single VMEM slab (1 DMA instead of 6).
    vecs = jnp.concatenate([ln1g, ln1b, bo, ln2g, ln2b, b2], axis=0)  # (6, C)
    # Block-diagonal (per folded batch) causal mask as an additive f32 bias.
    row = jnp.arange(NT, dtype=jnp.int32)[:, None]
    col = jnp.arange(NT, dtype=jnp.int32)[None, :]
    allowed = jnp.logical_and(row // T == col // T, row >= col)
    mask_bias = jnp.where(allowed, 0.0, NEG_INF).astype(jnp.float32)  # (NT, NT)
    return (vecs, mask_bias, wqkv, wo_b, w1_b, b1, w2_b)


def transformer_block(x, prepped):
    vecs, mask_bias, wqkv, wo_b, w1_b, b1, w2_b = prepped
    xf = x.reshape(NT, C)        # fold batch into rows: (B*T, C) = (32, 128)

    vmem = pl.BlockSpec(memory_space=pltpu.MemorySpace.VMEM)
    out = pl.pallas_call(
        transformer_block_kernel,
        out_shape=jax.ShapeDtypeStruct((NT, C), jnp.float32),
        in_specs=[vmem] * 8,     # whole arrays resident in VMEM, single invocation
        out_specs=vmem,
    )(xf, vecs, mask_bias, wqkv, wo_b, w1_b, b1, w2_b)
    return out.reshape(B, T, C)


def init_params(key):
    ks = jax.random.split(key, 8)
    s = 0.02
    wq = jax.random.normal(ks[0], (C, C), jnp.float32) * s
    wk = jax.random.normal(ks[1], (C, C), jnp.float32) * s
    wv = jax.random.normal(ks[2], (C, C), jnp.float32) * s
    wo = jax.random.normal(ks[3], (C, C), jnp.float32) * s
    bo = jax.random.normal(ks[4], (1, C), jnp.float32) * s
    w1 = jax.random.normal(ks[5], (C, HID), jnp.float32) * s
    b1 = jax.random.normal(ks[6], (1, HID), jnp.float32) * s
    w2 = jax.random.normal(ks[7], (HID, C), jnp.float32) * s
    b2 = jnp.zeros((1, C), jnp.float32)
    ln1g = jnp.ones((1, C), jnp.float32)
    ln1b = jnp.zeros((1, C), jnp.float32)
    ln2g = jnp.ones((1, C), jnp.float32)
    ln2b = jnp.zeros((1, C), jnp.float32)
    return (ln1g, ln1b, wq, wk, wv, wo, bo, ln2g, ln2b, w1, b1, w2, b2)


def reference(x, params):
    """Pure-JAX f32 reference mirroring the PyTorch forward (dropout = identity)."""
    (ln1g, ln1b, wq, wk, wv, wo, bo, ln2g, ln2b, w1, b1, w2, b2) = params

    def ln(z, g, b):
        mu = jnp.mean(z, axis=-1, keepdims=True)
        var = jnp.mean((z - mu) ** 2, axis=-1, keepdims=True)
        return (z - mu) * jax.lax.rsqrt(var + LN_EPS) * g + b

    xn = ln(x, ln1g[0], ln1b[0])
    q = xn @ wq
    k = xn @ wk
    v = xn @ wv
    qh = q.reshape(B, T, H, HS).transpose(0, 2, 1, 3)
    kh = k.reshape(B, T, H, HS).transpose(0, 2, 1, 3)
    vh = v.reshape(B, T, H, HS).transpose(0, 2, 1, 3)
    logits = jnp.einsum("bhtd,bhsd->bhts", qh, kh) / math.sqrt(HS)
    mask = jnp.tril(jnp.ones((T, T), bool))
    logits = jnp.where(mask, logits, -jnp.inf)
    wei = jax.nn.softmax(logits, axis=-1)
    oh = jnp.einsum("bhts,bhsd->bhtd", wei, vh)
    attn = oh.transpose(0, 2, 1, 3).reshape(B, T, C)
    x1 = x + attn @ wo + bo[0]
    x2n = ln(x1, ln2g[0], ln2b[0])
    ff = jnp.maximum(x2n @ w1 + b1[0], 0.0) @ w2 + b2[0]
    return x1 + ff


if __name__ == "__main__":
    key = jax.random.PRNGKey(0)
    kx, kp = jax.random.split(key)
    x = jax.random.normal(kx, (B, T, C), jnp.float32)
    params = init_params(kp)

    prepped = jax.block_until_ready(prepare_params(params))   # one-time prep
    out = transformer_block(x, prepped)
    out = jax.block_until_ready(out)

    ref = reference(x, params)
    assert out.shape == (B, T, C)
    # tolerance loosened vs. a pure-f32 version because matmul operands are bf16
    assert jnp.allclose(out, ref, atol=2e-2, rtol=2e-2), "mismatch vs reference"
    print("KERNEL_OK")
</pallas_src>

<mosaic_0001>
module attributes {stable_mosaic.version = 11 : i64} {
  func.func @transformer_block_kernel(%arg0: memref<32x128xf32, #tpu.memory_space<vmem>>, %arg1: memref<6x128xf32, #tpu.memory_space<vmem>>, %arg2: memref<32x32xf32, #tpu.memory_space<vmem>>, %arg3: memref<128x384xbf16, #tpu.memory_space<vmem>>, %arg4: memref<128x128xbf16, #tpu.memory_space<vmem>>, %arg5: memref<128x512xbf16, #tpu.memory_space<vmem>>, %arg6: memref<1x512xf32, #tpu.memory_space<vmem>>, %arg7: memref<512x128xbf16, #tpu.memory_space<vmem>>, %arg8: memref<32x128xf32, #tpu.memory_space<vmem>>) attributes {dimension_semantics = [], scalar_prefetch = 0 : i64, scratch_operands = 0 : i64, tpu.core_type = #tpu.core_type<tc>} {
    %c0 = arith.constant 0 : index
    %c0_0 = arith.constant 0 : index
    %0 = vector.load %arg0[%c0, %c0_0] : memref<32x128xf32, #tpu.memory_space<vmem>>, vector<32x128xf32>
    %c0_1 = arith.constant 0 : index
    %c0_2 = arith.constant 0 : index
    %1 = vector.load %arg1[%c0_1, %c0_2] : memref<6x128xf32, #tpu.memory_space<vmem>>, vector<1x128xf32>
    %c1 = arith.constant 1 : index
    %c0_3 = arith.constant 0 : index
    %2 = vector.load %arg1[%c1, %c0_3] : memref<6x128xf32, #tpu.memory_space<vmem>>, vector<1x128xf32>
    %c2 = arith.constant 2 : index
    %c0_4 = arith.constant 0 : index
    %3 = vector.load %arg1[%c2, %c0_4] : memref<6x128xf32, #tpu.memory_space<vmem>>, vector<1x128xf32>
    %c3 = arith.constant 3 : index
    %c0_5 = arith.constant 0 : index
    %4 = vector.load %arg1[%c3, %c0_5] : memref<6x128xf32, #tpu.memory_space<vmem>>, vector<1x128xf32>
    %c4 = arith.constant 4 : index
    %c0_6 = arith.constant 0 : index
    %5 = vector.load %arg1[%c4, %c0_6] : memref<6x128xf32, #tpu.memory_space<vmem>>, vector<1x128xf32>
    %c5 = arith.constant 5 : index
    %c0_7 = arith.constant 0 : index
    %6 = vector.load %arg1[%c5, %c0_7] : memref<6x128xf32, #tpu.memory_space<vmem>>, vector<1x128xf32>
    %cst = arith.constant dense<0.000000e+00> : vector<32xf32>
    %7 = vector.multi_reduction <add>, %0, %cst [1] : vector<32x128xf32> to vector<32xf32>
    %8 = vector.shape_cast %7 : vector<32xf32> to vector<32x1xf32>
    %cst_8 = arith.constant 1.280000e+02 : f32
    %9 = vector.broadcast %cst_8 : f32 to vector<32x1xf32>
    %10 = arith.divf %8, %9 : vector<32x1xf32>
    %11 = arith.mulf %0, %0 : vector<32x128xf32>
    %cst_9 = arith.constant dense<0.000000e+00> : vector<32xf32>
    %12 = vector.multi_reduction <add>, %11, %cst_9 [1] : vector<32x128xf32> to vector<32xf32>
    %13 = vector.shape_cast %12 : vector<32xf32> to vector<32x1xf32>
    %cst_10 = arith.constant 1.280000e+02 : f32
    %14 = vector.broadcast %cst_10 : f32 to vector<32x1xf32>
    %15 = arith.divf %13, %14 : vector<32x1xf32>
    %16 = arith.mulf %10, %10 : vector<32x1xf32>
    %17 = arith.subf %15, %16 : vector<32x1xf32>
    %18 = vector.broadcast %10 : vector<32x1xf32> to vector<32x128xf32>
    %19 = arith.subf %0, %18 : vector<32x128xf32>
    %cst_11 = arith.constant 9.99999974E-6 : f32
    %20 = vector.broadcast %cst_11 : f32 to vector<32x1xf32>
    %21 = arith.addf %17, %20 : vector<32x1xf32>
    %22 = math.rsqrt %21 : vector<32x1xf32>
    %23 = vector.broadcast %22 : vector<32x1xf32> to vector<32x128xf32>
    %24 = arith.mulf %19, %23 : vector<32x128xf32>
    %25 = vector.broadcast %1 : vector<1x128xf32> to vector<32x128xf32>
    %26 = arith.mulf %24, %25 : vector<32x128xf32>
    %27 = vector.broadcast %2 : vector<1x128xf32> to vector<32x128xf32>
    %28 = arith.addf %26, %27 : vector<32x128xf32>
    %29 = arith.truncf %28 : vector<32x128xf32> to vector<32x128xbf16>
    %c0_12 = arith.constant 0 : index
    %c0_13 = arith.constant 0 : index
    %30 = vector.load %arg3[%c0_12, %c0_13] : memref<128x384xbf16, #tpu.memory_space<vmem>>, vector<128x384xbf16>
    %cst_14 = arith.constant dense<0.000000e+00> : vector<32x384xf32>
    %31 = tpu.matmul %29, %30, %cst_14 {dimension_numbers = #tpu.dot_dimension_numbers<[1], [0], [0], [1], [0, 0, 1, 1], [], []>} : vector<32x128xbf16>, vector<128x384xbf16>, vector<32x384xf32> -> vector<32x384xf32>
    %32 = vector.extract_strided_slice %31 {offsets = [0, 0], sizes = [32, 128], strides = [1, 1]} : vector<32x384xf32> to vector<32x128xf32>
    %33 = vector.extract_strided_slice %31 {offsets = [0, 128], sizes = [32, 128], strides = [1, 1]} : vector<32x384xf32> to vector<32x128xf32>
    %34 = vector.extract_strided_slice %31 {offsets = [0, 256], sizes = [32, 128], strides = [1, 1]} : vector<32x384xf32> to vector<32x128xf32>
    %35 = vector.shape_cast %32 : vector<32x128xf32> to vector<32x4x32xf32>
    %36 = tpu.transpose %35, [1, 0, 2] : vector<32x4x32xf32> -> vector<4x32x32xf32>
    %37 = arith.truncf %36 : vector<4x32x32xf32> to vector<4x32x32xbf16>
    %38 = vector.shape_cast %33 : vector<32x128xf32> to vector<32x4x32xf32>
    %39 = tpu.transpose %38, [1, 0, 2] : vector<32x4x32xf32> -> vector<4x32x32xf32>
    %40 = arith.truncf %39 : vector<4x32x32xf32> to vector<4x32x32xbf16>
    %41 = vector.shape_cast %34 : vector<32x128xf32> to vector<32x4x32xf32>
    %42 = tpu.transpose %41, [1, 0, 2] : vector<32x4x32xf32> -> vector<4x32x32xf32>
    %43 = arith.truncf %42 : vector<4x32x32xf32> to vector<4x32x32xbf16>
    "tpu.trace_start"() <{level = 10 : i32, message = "hnd,hmd->hnm"}> : () -> ()
    %cst_15 = arith.constant dense<0.000000e+00> : vector<4x32x32xf32>
    %44 = tpu.matmul %37, %40, %cst_15 {dimension_numbers = #tpu.dot_dimension_numbers<[2], [2], [1], [1], [0, 0, 0, 1, 1, 1], [0], [0]>} : vector<4x32x32xbf16>, vector<4x32x32xbf16>, vector<4x32x32xf32> -> vector<4x32x32xf32>
    "tpu.trace_stop"() : () -> ()
    %c0_16 = arith.constant 0 : index
    %c0_17 = arith.constant 0 : index
    %45 = vector.load %arg2[%c0_16, %c0_17] : memref<32x32xf32, #tpu.memory_space<vmem>>, vector<32x32xf32>
    %46 = vector.shape_cast %45 : vector<32x32xf32> to vector<1x32x32xf32>
    %47 = vector.broadcast %46 : vector<1x32x32xf32> to vector<4x32x32xf32>
    %48 = arith.addf %44, %47 : vector<4x32x32xf32>
    %cst_18 = arith.constant dense<0xFF800000> : vector<4x32xf32>
    %49 = vector.multi_reduction <maximumf>, %48, %cst_18 [2] : vector<4x32x32xf32> to vector<4x32xf32>
    %50 = vector.shape_cast %49 : vector<4x32xf32> to vector<4x32x1xf32>
    %51 = vector.broadcast %50 : vector<4x32x1xf32> to vector<4x32x32xf32>
    %52 = arith.subf %48, %51 : vector<4x32x32xf32>
    %53 = math.exp %52 : vector<4x32x32xf32>
    %cst_19 = arith.constant dense<0.000000e+00> : vector<4x32xf32>
    %54 = vector.multi_reduction <add>, %53, %cst_19 [2] : vector<4x32x32xf32> to vector<4x32xf32>
    %55 = vector.shape_cast %54 : vector<4x32xf32> to vector<4x32x1xf32>
    %56 = tpu.reciprocal %55 {approx = true} : vector<4x32x1xf32> -> vector<4x32x1xf32>
    %57 = vector.broadcast %56 : vector<4x32x1xf32> to vector<4x32x32xf32>
    %58 = arith.mulf %53, %57 : vector<4x32x32xf32>
    %59 = arith.truncf %58 : vector<4x32x32xf32> to vector<4x32x32xbf16>
    "tpu.trace_start"() <{level = 10 : i32, message = "hnm,hmd->hnd"}> : () -> ()
    %cst_20 = arith.constant dense<0.000000e+00> : vector<4x32x32xf32>
    %60 = tpu.matmul %59, %43, %cst_20 {dimension_numbers = #tpu.dot_dimension_numbers<[2], [1], [1], [2], [0, 0, 0, 1, 1, 2], [0], [0]>} : vector<4x32x32xbf16>, vector<4x32x32xbf16>, vector<4x32x32xf32> -> vector<4x32x32xf32>
    "tpu.trace_stop"() : () -> ()
    %61 = tpu.transpose %60, [1, 0, 2] : vector<4x32x32xf32> -> vector<32x4x32xf32>
    %62 = vector.shape_cast %61 : vector<32x4x32xf32> to vector<32x128xf32>
    %63 = arith.truncf %62 : vector<32x128xf32> to vector<32x128xbf16>
    %c0_21 = arith.constant 0 : index
    %c0_22 = arith.constant 0 : index
    %64 = vector.load %arg4[%c0_21, %c0_22] : memref<128x128xbf16, #tpu.memory_space<vmem>>, vector<128x128xbf16>
    %cst_23 = arith.constant dense<0.000000e+00> : vector<32x128xf32>
    %65 = tpu.matmul %63, %64, %cst_23 {dimension_numbers = #tpu.dot_dimension_numbers<[1], [0], [0], [1], [0, 0, 1, 1], [], []>} : vector<32x128xbf16>, vector<128x128xbf16>, vector<32x128xf32> -> vector<32x128xf32>
    %66 = vector.broadcast %3 : vector<1x128xf32> to vector<32x128xf32>
    %67 = arith.addf %65, %66 : vector<32x128xf32>
    %68 = arith.addf %0, %67 : vector<32x128xf32>
    %cst_24 = arith.constant dense<0.000000e+00> : vector<32xf32>
    %69 = vector.multi_reduction <add>, %68, %cst_24 [1] : vector<32x128xf32> to vector<32xf32>
    %70 = vector.shape_cast %69 : vector<32xf32> to vector<32x1xf32>
    %cst_25 = arith.constant 1.280000e+02 : f32
    %71 = vector.broadcast %cst_25 : f32 to vector<32x1xf32>
    %72 = arith.divf %70, %71 : vector<32x1xf32>
    %73 = arith.mulf %68, %68 : vector<32x128xf32>
    %cst_26 = arith.constant dense<0.000000e+00> : vector<32xf32>
    %74 = vector.multi_reduction <add>, %73, %cst_26 [1] : vector<32x128xf32> to vector<32xf32>
    %75 = vector.shape_cast %74 : vector<32xf32> to vector<32x1xf32>
    %cst_27 = arith.constant 1.280000e+02 : f32
    %76 = vector.broadcast %cst_27 : f32 to vector<32x1xf32>
    %77 = arith.divf %75, %76 : vector<32x1xf32>
    %78 = arith.mulf %72, %72 : vector<32x1xf32>
    %79 = arith.subf %77, %78 : vector<32x1xf32>
    %80 = vector.broadcast %72 : vector<32x1xf32> to vector<32x128xf32>
    %81 = arith.subf %68, %80 : vector<32x128xf32>
    %cst_28 = arith.constant 9.99999974E-6 : f32
    %82 = vector.broadcast %cst_28 : f32 to vector<32x1xf32>
    %83 = arith.addf %79, %82 : vector<32x1xf32>
    %84 = math.rsqrt %83 : vector<32x1xf32>
    %85 = vector.broadcast %84 : vector<32x1xf32> to vector<32x128xf32>
    %86 = arith.mulf %81, %85 : vector<32x128xf32>
    %87 = vector.broadcast %4 : vector<1x128xf32> to vector<32x128xf32>
    %88 = arith.mulf %86, %87 : vector<32x128xf32>
    %89 = vector.broadcast %5 : vector<1x128xf32> to vector<32x128xf32>
    %90 = arith.addf %88, %89 : vector<32x128xf32>
    %91 = arith.truncf %90 : vector<32x128xf32> to vector<32x128xbf16>
    %c0_29 = arith.constant 0 : index
    %c0_30 = arith.constant 0 : index
    %92 = vector.load %arg5[%c0_29, %c0_30] : memref<128x512xbf16, #tpu.memory_space<vmem>>, vector<128x512xbf16>
    %cst_31 = arith.constant dense<0.000000e+00> : vector<32x512xf32>
    %93 = tpu.matmul %91, %92, %cst_31 {dimension_numbers = #tpu.dot_dimension_numbers<[1], [0], [0], [1], [0, 0, 1, 1], [], []>} : vector<32x128xbf16>, vector<128x512xbf16>, vector<32x512xf32> -> vector<32x512xf32>
    %c0_32 = arith.constant 0 : index
    %c0_33 = arith.constant 0 : index
    %94 = vector.load %arg6[%c0_32, %c0_33] : memref<1x512xf32, #tpu.memory_space<vmem>>, vector<1x512xf32>
    %95 = vector.broadcast %94 : vector<1x512xf32> to vector<32x512xf32>
    %96 = arith.addf %93, %95 : vector<32x512xf32>
    %cst_34 = arith.constant 0.000000e+00 : f32
    %97 = vector.broadcast %cst_34 : f32 to vector<32x512xf32>
    %98 = arith.maximumf %96, %97 : vector<32x512xf32>
    %99 = arith.truncf %98 : vector<32x512xf32> to vector<32x512xbf16>
    %c0_35 = arith.constant 0 : index
    %c0_36 = arith.constant 0 : index
    %100 = vector.load %arg7[%c0_35, %c0_36] : memref<512x128xbf16, #tpu.memory_space<vmem>>, vector<512x128xbf16>
    %cst_37 = arith.constant dense<0.000000e+00> : vector<32x128xf32>
    %101 = tpu.matmul %99, %100, %cst_37 {dimension_numbers = #tpu.dot_dimension_numbers<[1], [0], [0], [1], [0, 0, 1, 1], [], []>} : vector<32x512xbf16>, vector<512x128xbf16>, vector<32x128xf32> -> vector<32x128xf32>
    %102 = vector.broadcast %6 : vector<1x128xf32> to vector<32x128xf32>
    %103 = arith.addf %101, %102 : vector<32x128xf32>
    %104 = arith.addf %68, %103 : vector<32x128xf32>
    %c0_38 = arith.constant 0 : index
    %c0_39 = arith.constant 0 : index
    %105 = vector.load %arg8[%c0_38, %c0_39] : memref<32x128xf32, #tpu.memory_space<vmem>>, vector<32x128xf32>
    tpu.vector_store %arg8[%c0_38, %c0_39], %104 {strides = array<i32>} : memref<32x128xf32, #tpu.memory_space<vmem>>, vector<32x128xf32>,
    return
  }
}

</mosaic_0001>

<bundles_post_ra>
// kernel: tpu_custom_call.1
= control target key start
LH: loop header
LB: loop body
LE: loop exit
PB: predicated region body
PF: predicated region fallthrough
CT: control target
= control target key end

     0   :  { %13 = vsyncpa [#allocation3], 0  ;;  %s6400_s0 = inlined_call_operand.hbm [shape: f32[32,128], index: 0, kind: input, shape index: {}]   ;;  %s6401_s1 = inlined_call_operand.hbm [shape: f32[6,128], index: 1, kind: input, shape index: {}]   ;;  %s6402_s2 = inlined_call_operand.hbm [shape: f32[32,32], index: 2, kind: input, shape index: {}]   ;;  %s6403_s3 = inlined_call_operand.hbm [shape: bf16[128,384], index: 3, kind: input, shape index: {}]   ;;  %s6404_s4 = inlined_call_operand.hbm [shape: bf16[128,128], index: 4, kind: input, shape index: {}]   ;;  %s6405_s5 = inlined_call_operand.hbm [shape: bf16[128,512], index: 5, kind: input, shape index: {}]   ;;  %s6406_s6 = inlined_call_operand.vmem [shape: f32[1,512], index: 6, kind: input, shape index: {}]   ;;  %s6407_s7 = inlined_call_operand.hbm [shape: bf16[512,128], index: 7, kind: input, shape index: {}]   ;;  %s6408_s8 = inlined_call_operand.hbm [shape: f32[32,128], index: 8, kind: output, shape index: {}]  }
   0x1   :  { %14 = vsyncpa [#allocation6], 0 }
   0x2   :  { %15 = vsyncpa [#allocation9], 0 }
   0x3   :  { %16 = vsyncpa [#allocation12], 0 }
   0x4   :  { %17 = vsyncpa [#allocation4], 0  ;;  %s5236_s27 = smov [#allocation5]   ;;  %s5237_s29 = smov [#allocation8]  }
   0x5   :  { %s36_s28 = sshll.u32 %s5236_s27, 4  ;;  %s57_s30 = sshll.u32 %s5237_s29, 4  ;;  %s37_s28 = int_to_ptr.vmem [resolvable:$true] %s36_s28  ;;  %s5302_s30 = int_to_ptr.vmem [resolvable:$true] %s57_s30 }
   0x6   :  { %s5050_s11 = scalar_lea.hbm %s6401_s1, 128 }
   0x7   :  { %p5051_p0 = scmp.ne.s32.totalorder %s6401_s1, %s5050_s11  ;;  %p5054_p1 = scmp.lt.u32.totalorder %s5050_s11, %s6401_s1 }
   0x9   :  { %p5056_p2 = pnand %p5054_p1, %p5051_p0 }
   0xb   :  { %5059 = shalt.err (!%p5056_p2)
}
   0xc   :  { %s5060_s16 = scalar_lea.vmem %s37_s28, 128  ;;  %p5065_p4 = scmp.lt.s32.totalorder %s37_s28, %s37_s28 }
   0xd   :  { %p5061_p3 = scmp.ne.s32.totalorder %s37_s28, %s5060_s16  ;;  %p5066_p5 = scmp.lt.s32.totalorder %s5060_s16, %s5060_s16 }
   0xf   :  { %p5067_p6 = por %p5066_p5, %p5065_p4 }
  0x11   :  { %p5068_p7 = pnand %p5067_p6, %p5061_p3 }
  0x13   :  { %5071 = shalt.err (!%p5068_p7)
}
  0x14   :  { %39 = dma.hbm_to_vmem [thread:$0]  %s6401_s1, 128, %s37_s28, [#allocation6]  }
  0x15   :  { %s5072_s21 = scalar_lea.hbm %s6403_s3, 3072 }
  0x16   :  { %p5073_p8 = scmp.ne.s32.totalorder %s6403_s3, %s5072_s21  ;;  %p5076_p9 = scmp.lt.u32.totalorder %s5072_s21, %s6403_s3 }
  0x18   :  { %p5078_p10 = pnand %p5076_p9, %p5073_p8 }
  0x1a   :  { %5081 = shalt.err (!%p5078_p10)
}
  0x1b   :  { %s5082_s26 = scalar_lea.vmem %s5302_s30, 3072  ;;  %p5087_p12 = scmp.lt.s32.totalorder %s5302_s30, %s5302_s30 }
  0x1c   :  { %p5083_p11 = scmp.ne.s32.totalorder %s5302_s30, %s5082_s26  ;;  %p5088_p13 = scmp.lt.s32.totalorder %s5082_s26, %s5082_s26 }
  0x1e   :  { %p5089_p0 = por %p5088_p13, %p5087_p12 }
  0x20   :  { %p5090_p1 = pnand %p5089_p0, %p5083_p11 }
  0x22   :  { %5093 = shalt.err (!%p5090_p1)
}
  0x23   :  { %s5238_s1 = smov 192   ;;  %s5239_s27 = smov 12  }
  0x24   :  { %63 = dma.hbm_to_vmem [thread:$0]  %s6403_s3, 3072, %s5302_s30, [#allocation9], %s5238_s1, %s5238_s1, %s5239_s27  }
  0x25   :  { %s5240_s9 = smov [#allocation11]   ;;  %s5094_s13 = scalar_lea.hbm %s6405_s5, 4096 }
  0x26   :  { %s81_s10 = sshll.u32 %s5240_s9, 4  ;;  %p5095_p2 = scmp.ne.s32.totalorder %s6405_s5, %s5094_s13  ;;  %s82_s10 = int_to_ptr.vmem [resolvable:$true] %s81_s10 }
  0x27   :  { %p5098_p3 = scmp.lt.u32.totalorder %s5094_s13, %s6405_s5 }
  0x29   :  { %p5100_p4 = pnand %p5098_p3, %p5095_p2 }
  0x2b   :  { %5103 = shalt.err (!%p5100_p4)
}
  0x2c   :  { %s5104_s18 = scalar_lea.vmem %s82_s10, 4096  ;;  %p5109_p6 = scmp.lt.s32.totalorder %s82_s10, %s82_s10 }
  0x2d   :  { %p5105_p5 = scmp.ne.s32.totalorder %s82_s10, %s5104_s18  ;;  %p5110_p7 = scmp.lt.s32.totalorder %s5104_s18, %s5104_s18 }
  0x2f   :  { %p5111_p8 = por %p5110_p7, %p5109_p6 }
  0x31   :  { %p5112_p9 = pnand %p5111_p8, %p5105_p5 }
  0x33   :  { %5115 = shalt.err (!%p5112_p9)
}
  0x34   :  { %s5241_s3 = smov 256   ;;  %s5242_s30 = smov 16  }
  0x35   :  { %87 = dma.hbm_to_vmem [thread:$0]  %s6405_s5, 4096, %s82_s10, [#allocation12], %s5241_s3, %s5241_s3, %s5242_s30  }
  0x36   :  { %s5243_s21 = smov [#allocation2]   ;;  %s5116_s25 = scalar_lea.hbm %s6400_s0, 512 }
  0x37   :  { %s23_s22 = sshll.u32 %s5243_s21, 4  ;;  %p5117_p10 = scmp.ne.s32.totalorder %s6400_s0, %s5116_s25  ;;  %s24_s22 = int_to_ptr.vmem [resolvable:$true] %s23_s22 }
  0x38   :  { %p5120_p11 = scmp.lt.u32.totalorder %s5116_s25, %s6400_s0 }
  0x3a   :  { %p5122_p12 = pnand %p5120_p11, %p5117_p10 }
  0x3c   :  { %5125 = shalt.err (!%p5122_p12)
}
  0x3d   :  { %s5126_s29 = scalar_lea.vmem %s24_s22, 512  ;;  %p5131_p0 = scmp.lt.s32.totalorder %s24_s22, %s24_s22 }
  0x3e   :  { %p5127_p13 = scmp.ne.s32.totalorder %s24_s22, %s5126_s29  ;;  %p5132_p1 = scmp.lt.s32.totalorder %s5126_s29, %s5126_s29 }
  0x40   :  { %p5133_p2 = por %p5132_p1, %p5131_p0 }
  0x42   :  { %p5134_p3 = pnand %p5133_p2, %p5127_p13 }
  0x44   :  { %5137 = shalt.err (!%p5134_p3)
}
  0x45   :  { %s5244_s5 = smov 128   ;;  %s5245_s9 = smov 8  }
  0x46   :  { %29 = dma.hbm_to_vmem [thread:$0]  %s6400_s0, 512, %s24_s22, [#allocation3], %s5244_s5, %s5244_s5, %s5245_s9  }
  0x47   :  { %s5246_s12 = smov [#allocation7]   ;;  %s5247_s14 = smov [#allocation10]  }
  0x48   :  { %s45_s13 = sshll.u32 %s5246_s12, 4  ;;  %s69_s15 = sshll.u32 %s5247_s14, 4  ;;  %s46_s13 = int_to_ptr.vmem [resolvable:$true] %s45_s13  ;;  %s5360_s15 = int_to_ptr.vmem [resolvable:$true] %s69_s15 }
  0x49   :  { %s5138_s18 = scalar_lea.hbm %s6402_s2, 512 }
  0x4a   :  { %p5139_p4 = scmp.ne.s32.totalorder %s6402_s2, %s5138_s18  ;;  %p5142_p5 = scmp.lt.u32.totalorder %s5138_s18, %s6402_s2 }
  0x4c   :  { %p5144_p6 = pnand %p5142_p5, %p5139_p4 }
  0x4e   :  { %5147 = shalt.err (!%p5144_p6)
}
  0x4f   :  { %s5148_s0 = scalar_lea.vmem %s46_s13, 512  ;;  %p5153_p8 = scmp.lt.s32.totalorder %s46_s13, %s46_s13 }
  0x50   :  { %p5149_p7 = scmp.ne.s32.totalorder %s46_s13, %s5148_s0  ;;  %p5154_p9 = scmp.lt.s32.totalorder %s5148_s0, %s5148_s0 }
  0x52   :  { %p5155_p10 = por %p5154_p9, %p5153_p8 }
  0x54   :  { %p5156_p11 = pnand %p5155_p10, %p5149_p7 }
  0x56   :  { %5159 = shalt.err (!%p5156_p11)
}
  0x57   :  { %51 = dma.hbm_to_vmem [thread:$0]  %s6402_s2, 512, %s46_s13, [#allocation6], %s5244_s5, %s5244_s5, %s5245_s9  }
  0x58   :  { %s5160_s25 = scalar_lea.hbm %s6404_s4, 1024 }
  0x59   :  { %p5161_p12 = scmp.ne.s32.totalorder %s6404_s4, %s5160_s25  ;;  %p5164_p13 = scmp.lt.u32.totalorder %s5160_s25, %s6404_s4 }
  0x5b   :  { %p5166_p0 = pnand %p5164_p13, %p5161_p12 }
  0x5d   :  { %5169 = shalt.err (!%p5166_p0)
}
  0x5e   :  { %s5170_s29 = scalar_lea.vmem %s5360_s15, 1024  ;;  %p5175_p2 = scmp.lt.s32.totalorder %s5360_s15, %s5360_s15 }
  0x5f   :  { %p5171_p1 = scmp.ne.s32.totalorder %s5360_s15, %s5170_s29  ;;  %p5176_p3 = scmp.lt.s32.totalorder %s5170_s29, %s5170_s29 }
  0x61   :  { %p5177_p4 = por %p5176_p3, %p5175_p2 }
  0x63   :  { %p5178_p5 = pnand %p5177_p4, %p5171_p1 }
  0x65   :  { %5181 = shalt.err (!%p5178_p5)
}
  0x66   :  { %s5248_s2 = smov 64   ;;  %s5249_s10 = smov 4  }
  0x67   :  { %75 = dma.hbm_to_vmem [thread:$0]  %s6404_s4, 1024, %s5360_s15, [#allocation9], %s5248_s2, %s5248_s2, %s5249_s10  }
  0x68   :  { %s5250_s13 = smov [#allocation13]   ;;  %s5182_s18 = scalar_lea.hbm %s6407_s7, 4096 }
  0x69   :  { %s95_s14 = sshll.u32 %s5250_s13, 4  ;;  %p5183_p6 = scmp.ne.s32.totalorder %s6407_s7, %s5182_s18  ;;  %s96_s14 = int_to_ptr.vmem [resolvable:$true] %s95_s14 }
  0x6a   :  { %p5186_p7 = scmp.lt.u32.totalorder %s5182_s18, %s6407_s7 }
  0x6c   :  { %p5188_p8 = pnand %p5186_p7, %p5183_p6 }
  0x6e   :  { %5191 = shalt.err (!%p5188_p8)
}
  0x6f   :  { %s5192_s0 = scalar_lea.vmem %s96_s14, 4096  ;;  %p5197_p10 = scmp.lt.s32.totalorder %s96_s14, %s96_s14 }
  0x70   :  { %p5193_p9 = scmp.ne.s32.totalorder %s96_s14, %s5192_s0  ;;  %p5198_p11 = scmp.lt.s32.totalorder %s5192_s0, %s5192_s0 }
  0x72   :  { %p5199_p12 = por %p5198_p11, %p5197_p10 }
  0x74   :  { %p5200_p13 = pnand %p5199_p12, %p5193_p9 }
  0x76   :  { %5203 = shalt.err (!%p5200_p13)
}
  0x77   :  { %101 = dma.hbm_to_vmem [thread:$0]  %s6407_s7, 4096, %s96_s14, [#allocation12], %s5248_s2, %s5248_s2, %s5249_s10  }
  0x78   :  { %5226 = dma.done.wait [#allocation3], 512  }
  0x79   :  { %5227 = vsyncadd [#allocation3], 4294966784 }
  0x7a   :  { %5228 = dma.done.wait [#allocation6], 640  }
  0x7b   :  { %5229 = vsyncadd [#allocation6], 4294966656 }
  0x7c   :  { %5230 = dma.done.wait [#allocation9], 4096  }
  0x7d   :  { %5231 = vsyncadd [#allocation9], 4294963200 }
  0x7e   :  { %5232 = dma.done.wait [#allocation12], 8192  }
  0x7f   :  { %5233 = vsyncadd [#allocation12], 4294959104  ;;  %v5410_v0 = vld [vmem:[#allocation2] sm:$0xff]  ;;  %v5412_v1 = vld [vmem:[#allocation2 + $0x8] sm:$0xff]  ;;  %v5251_v30 = vmov 0   ;;  %s5252_s7 = smov 96  }
  0x80   :  { %134 = vadd.xlane.f32.xlu0 %v5410_v0  ;;  %v147_v2 = vmul.f32 %v5410_v0, %v5410_v0  ;;  %v4846_v3 = vld [vmem:[#allocation8 + $0x4] ss:$12 sps:$4 sm:$0xff]   ;;  %v148_v4 = vmul.f32 %v5412_v1, %v5412_v1  ;;  %v5419_v5 = vld [vmem:[#allocation2 + $0x10] sm:$0xff]  ;;  %v4852_v12 = vld [vmem:[#allocation8 + $0x34] ss:$12 sps:$4 sm:$0xff]   ;;  %397 = vmatprep.mubr.bf16.mxu0 %v5251_v30  ;;  %s5253_s21 = smov 32  }
  0x81   :  { %365 = vmatprep.subr.bf16.mxu0 %v4846_v3  ;;  %v5422_v6 = vld [vmem:[#allocation2 + $0x18] sm:$0xff]  ;;  %v149_v7 = vmul.f32 %v5419_v5, %v5419_v5  ;;  %v4848_v9 = vld [vmem:[#allocation8] ss:$12 sps:$4 sm:$0xff]   ;;  %v4849_v10 = vld [vmem:[#allocation8 + $0x1c] ss:$12 sps:$4 sm:$0xff]   ;;  %vm2247_vm0 = vcmask 261120  }
  0x82   :  { %151 = vadd.xlane.f32.xlu1 %v147_v2  ;;  %v150_v8 = vmul.f32 %v5422_v6, %v5422_v6  ;;  %366 = vmatpush1.bf16.msra.mxu0 %v4848_v9  ;;  %v4851_v11 = vld [vmem:[#allocation8 + $0x18] ss:$12 sps:$4 sm:$0xff]   ;;  %v4854_v13 = vld [vmem:[#allocation8 + $0x8] ss:$12 sps:$4 sm:$0xff]   ;;  %v4855_v14 = vld [vmem:[#allocation8 + $0x30] ss:$12 sps:$4 sm:$0xff]  }
  0x83   :  { %367 = vmatprep.subr.bf16.mxu0 %v4849_v10  ;;  %4683 = vmatprep.subr.bf16.mxu1 %v4854_v13  ;;  %v4856_v15 = vld [vmem:[#allocation8 + $0x4c] ss:$12 sps:$4 sm:$0xff]   ;;  %v4859_v17 = vld [vmem:[#allocation8 + $0x48] ss:$12 sps:$4 sm:$0xff]   ;;  %v4860_v18 = vld [vmem:[#allocation8 + $0x64] ss:$12 sps:$4 sm:$0xff]  }
  0x84   :  { %136 = vadd.xlane.f32.xlu0 %v5412_v1  ;;  %4684 = vmatpush3.bf16.msra.mxu1 %v4854_v13  ;;  %v4858_v16 = vld [vmem:[#allocation8 + $0x20] ss:$12 sps:$4 sm:$0xff]   ;;  %v4862_v19 = vld [vmem:[#allocation8 + $0x38] ss:$12 sps:$4 sm:$0xff]   ;;  %v4864_v21 = vld [vmem:[#allocation8 + $0x7c] ss:$12 sps:$4 sm:$0xff]  }
  0x85   :  { %4685 = vmatprep.subr.bf16.mxu1 %v4858_v16  ;;  %v4863_v20 = vld [vmem:[#allocation8 + $0x60] ss:$12 sps:$4 sm:$0xff]   ;;  %v4866_v22 = vld [vmem:[#allocation8 + $0x50] ss:$12 sps:$4 sm:$0xff]   ;;  %v4867_v23 = vld [vmem:[#allocation8 + $0x78] ss:$12 sps:$4 sm:$0xff]  }
  0x86   :  { %153 = vadd.xlane.f32.xlu1 %v148_v4  ;;  %368 = vmatpush1.bf16.msra.mxu0 %v4851_v11  ;;  %v4868_v24 = vld [vmem:[#allocation8 + $0x94] ss:$12 sps:$4 sm:$0xff]   ;;  %v4871_v26 = vld [vmem:[#allocation8 + $0x90] ss:$12 sps:$4 sm:$0xff]   ;;  %v4872_v27 = vld [vmem:[#allocation8 + $0xac] ss:$12 sps:$4 sm:$0xff]  }
  0x87   :  { %369 = vmatprep.subr.bf16.mxu0 %v4852_v12  ;;  %v4870_v25 = vld [vmem:[#allocation8 + $0x68] ss:$12 sps:$4 sm:$0xff]   ;;  %v4874_v28 = vld [vmem:[#allocation8 + $0x80] ss:$12 sps:$4 sm:$0xff]   ;;  %v4876_v31 = vld [vmem:[#allocation8 + $0x98] ss:$12 sps:$4 sm:$0xff]  }
  0x88   :  { %138 = vadd.xlane.f32.xlu0 %v5419_v5  ;;  %4686 = vmatpush3.bf16.msra.mxu1 %v4858_v16  ;;  %v4875_v29 = vld [vmem:[#allocation8 + $0xa8] ss:$12 sps:$4 sm:$0xff]   ;;  %v4877_v32 = vld [vmem:[#allocation8 + $0xb0] ss:$12 sps:$4 sm:$0xff]   ;;  %v4425_v2 = vld [vmem:[#allocation5] ss:$0 sm:$0xff] }
  0x89   :  { %4687 = vmatprep.subr.bf16.mxu1 %v4862_v19  ;;  %v4426_v9 = vld [vmem:[#allocation5 + $0x1] ss:$0 sm:$0xff]  ;;  %vm3492_vm1 = vcmask 523264   ;;  %vm3497_vm2 = vcmask 785408  }
  0x8a   :  { %140 = vadd.xlane.f32.xlu1 %v5422_v6  ;;  %370 = vmatpush1.bf16.msra.mxu0 %v4855_v14 }
  0x8b   :  { %371 = vmatprep.subr.bf16.mxu0 %v4856_v15 }
  0x8c   :  { %155 = vadd.xlane.f32.xlu0 %v149_v7  ;;  %4688 = vmatpush3.bf16.msra.mxu1 %v4862_v19 }
  0x8d   :  { %4689 = vmatprep.subr.bf16.mxu1 %v4866_v22 }
  0x8e   :  { %157 = vadd.xlane.f32.xlu1 %v150_v8  ;;  %372 = vmatpush1.bf16.msra.mxu0 %v4859_v17 }
  0x8f   :  { %373 = vmatprep.subr.bf16.mxu0 %v4860_v18 }
  0x90   :  { %4690 = vmatpush3.bf16.msra.mxu1 %v4866_v22 }
  0x91   :  { %4691 = vmatprep.subr.bf16.mxu1 %v4870_v25 }
  0x92   :  { %374 = vmatpush1.bf16.msra.mxu0 %v4863_v20 }
  0x93   :  { %375 = vmatprep.subr.bf16.mxu0 %v4864_v21 }
  0x94   :  { %4692 = vmatpush3.bf16.msra.mxu1 %v4870_v25 }
  0x95   :  { %4693 = vmatprep.subr.bf16.mxu1 %v4874_v28 }
  0x96   :  { %376 = vmatpush1.bf16.msra.mxu0 %v4867_v23 }
  0x97   :  { %377 = vmatprep.subr.bf16.mxu0 %v4868_v24 }
  0x98   :  { %4694 = vmatpush3.bf16.msra.mxu1 %v4874_v28 }
  0x99   :  { %4695 = vmatprep.subr.bf16.mxu1 %v4876_v31 }
  0x9a   :  { %378 = vmatpush1.bf16.msra.mxu0 %v4871_v26 }
  0x9b   :  { %379 = vmatprep.subr.bf16.mxu0 %v4872_v27 }
  0x9c   :  { %4696 = vmatpush3.bf16.msra.mxu1 %v4876_v31 }
  0x9d   :  { %4697 = vmatprep.subr.bf16.mxu1 %v4877_v32 }
  0x9e   :  { %380 = vmatpush1.bf16.msra.mxu0 %v4875_v29 }
  0xa0   :  { %4698 = vmatpush3.bf16.msra.mxu1 %v4877_v32 }
 0x10d   :  { %v135_v33 = vpop.xlane.xlu0 %134 }
 0x10e   :  { %v143_v34 = vmul.f32 0.0078125, %v135_v33 }
 0x10f   :  { %v152_v35 = vpop.xlane.xlu1 %151 }
 0x110   :  { %v163_v36 = vmul.f32 %v143_v34, %v143_v34  ;;  %v159_v37 = vmul.f32 0.0078125, %v152_v35  ;;  %v171_v60 = vsub.f32 %v5410_v0, %v143_v34  ;;  %v5254_v35 = vmov 1983009808  }
 0x111   :  { %v137_v38 = vpop.xlane.xlu0 %136 }
 0x112   :  { %v167_v39 = vsub.f32 %v159_v37, %v163_v36  ;;  %v144_v40 = vmul.f32 0.0078125, %v137_v38  ;;  %v510_v36 = vunpack.c.l.s4 %v5254_v35  ;;  %v512_v37 = vlaneseq }
 0x113   :  { %v154_v41 = vpop.xlane.xlu1 %153 }
 0x114   :  { %v175_v42 = vadd.f32 1e-05, %v167_v39  ;;  %v164_v43 = vmul.f32 %v144_v40, %v144_v40  ;;  %v160_v44 = vmul.f32 0.0078125, %v154_v41  ;;  %v172_v3 = vsub.f32 %v5412_v1, %v144_v40 }
 0x115   :  { %v139_v45 = vpop.xlane.xlu0 %138  ;;  %v511_v40 = vunpack.c.0.s8 %v510_v36  ;;  %v5518_v41 = vshrl.u32 %v512_v37, 7 }
 0x116   :  { %4966 = vrsqrt.f32 %v175_v42  ;;  %v168_v46 = vsub.f32 %v160_v44, %v164_v43  ;;  %v145_v47 = vmul.f32 0.0078125, %v139_v45  ;;  %v5255_v43 = vmov 1934713408  }
 0x117   :  { %v141_v48 = vpop.xlane.xlu1 %140  ;;  %v542_v44 = vunpack.c.l.s4 %v5255_v43 }
 0x118   :  { %v176_v49 = vadd.f32 1e-05, %v168_v46  ;;  %v165_v50 = vmul.f32 %v145_v47, %v145_v47  ;;  %v146_v51 = vmul.f32 0.0078125, %v141_v48  ;;  %v173_v10 = vsub.f32 %v5419_v5, %v145_v47 }
 0x119   :  { %v156_v52 = vpop.xlane.xlu0 %155  ;;  %v5521_v46 = vsub.s32 %v511_v40, %v5518_v41 }
 0x11a   :  { %4968 = vrsqrt.f32 %v176_v49  ;;  %v166_v53 = vmul.f32 %v146_v51, %v146_v51  ;;  %v161_v54 = vmul.f32 0.0078125, %v156_v52  ;;  %v174_v12 = vsub.f32 %v5422_v6, %v146_v51 }
 0x11b   :  { %v158_v55 = vpop.xlane.xlu1 %157  ;;  %v543_v51 = vunpack.c.0.s8 %v542_v44 }
 0x11c   :  { %v169_v56 = vsub.f32 %v161_v54, %v165_v50  ;;  %v162_v57 = vmul.f32 0.0078125, %v158_v55 }
 0x11e   :  { %v177_v58 = vadd.f32 1e-05, %v169_v56  ;;  %v170_v59 = vsub.f32 %v162_v57, %v166_v53 }
 0x120   :  { %v4967_v61 = vpop.eup %4966  ;;  %4970 = vrsqrt.f32 %v177_v58  ;;  %v178_v62 = vadd.f32 1e-05, %v170_v59  ;;  %v5529_v59 = vsub.s32 %v543_v51, %v5518_v41 }
 0x121   :  { %v183_v63 = vmul.f32 %v4967_v61, %v171_v60 }
 0x122   :  { %4972 = vrsqrt.f32 %v178_v62 }
 0x123   :  { %v191_v8 = vmul.f32 %v4425_v2, %v183_v63 }
 0x124   :  { %v4969_v4 = vpop.eup %4968 }
 0x125   :  { %v184_v7 = vmul.f32 %v4969_v4, %v172_v3  ;;  %v199_v13 = vadd.f32 %v4426_v9, %v191_v8 }
 0x127   :  { %v192_v11 = vmul.f32 %v4425_v2, %v184_v7 }
 0x129   :  { %v200_v14 = vadd.f32 %v4426_v9, %v192_v11 }
 0x12a   :  { %v4971_v0 = vpop.eup %4970 }
 0x12b   :  { %v203_v15 = vpack.c.bf16 %v200_v14, %v199_v13  ;;  %v185_v16 = vmul.f32 %v4971_v0, %v173_v10 }
 0x12c   :  { %v4973_v17 = vpop.eup %4972 }
 0x12d   :  { %398 = vmatmul.mubr.bf16.vlgmr.msra.gmra.mrb[0].mxu0 %v203_v15  ;;  %4699 = vmatprep.mubr.bf16.mxu1 %v203_v15  ;;  %v186_v18 = vmul.f32 %v4973_v17, %v174_v12  ;;  %v193_v19 = vmul.f32 %v4425_v2, %v185_v16 }
 0x12e   :  { %407 = vmatprep.mubr.bf16.mxu0 %v5251_v30 }
 0x12f   :  { %v194_v1 = vmul.f32 %v4425_v2, %v186_v18  ;;  %v201_v20 = vadd.f32 %v4426_v9, %v193_v19 }
 0x131   :  { %v202_v21 = vadd.f32 %v4426_v9, %v194_v1 }
 0x133   :  { %v204_v22 = vpack.c.bf16 %v202_v21, %v201_v20 }
 0x135   :  { %408 = vmatmul.mubr.bf16.gmra.mrb[4].mxu0 %v204_v22  ;;  %4700 = vmatmul.mubr.bf16.vlgmr.msra.gmra.mrb[0].mxu1 %v204_v22 }
 0x200   :  { %v5436_v5 = vpop.f32.mrb[0].mxu0 }
 0x201   :  { %471 = vrot.lane.b32.xlu0 %v5436_v5, %s5252_s7  ;;  %v5440_v6 = vpop.f32.mrb[1].mxu0 }
 0x202   :  { %1075 = vrot.lane.b32.xlu1 %v5440_v6, %s5248_s2  ;;  %v5444_v23 = vpop.f32.mrb[2].mxu0 }
 0x203   :  { %v5446_v24 = vpop.f32.mrb[3].mxu0 }
 0x205   :  { %483 = vrot.lane.b32.xlu0 %v5436_v5, %s5248_s2 }
 0x206   :  { %473 = vrot.lane.b32.xlu1 %v5444_v23, %s5252_s7 }
 0x208   :  { %v5452_v25 = vpop.f32.mrb[4].mxu0  ;;  %v5454_v26 = vpop.f32.mrb[0].mxu1 }
 0x209   :  { %495 = vrot.lane.b32.xlu0 %v5436_v5, %s5253_s21  ;;  %v5458_v27 = vpop.f32.mrb[5].mxu0  ;;  %v5460_v28 = vpop.f32.mrb[1].mxu1 }
 0x20a   :  { %485 = vrot.lane.b32.xlu1 %v5444_v23, %s5248_s2  ;;  %v5464_v29 = vpop.f32.mrb[6].mxu0  ;;  %v5466_v31 = vpop.f32.mrb[2].mxu1 }
 0x20b   :  { %v5468_v32 = vpop.f32.mrb[7].mxu0  ;;  %v5470_v33 = vpop.f32.mrb[3].mxu1 }
 0x20d   :  { %1063 = vrot.lane.b32.xlu0 %v5440_v6, %s5252_s7 }
 0x20e   :  { %497 = vrot.lane.b32.xlu1 %v5444_v23, %s5253_s21 }
 0x211   :  { %1087 = vrot.lane.b32.xlu0 %v5440_v6, %s5253_s21 }
 0x212   :  { %1065 = vrot.lane.b32.xlu1 %v5446_v24, %s5252_s7 }
 0x215   :  { %1067 = vrot.lane.b32.xlu0 %v5458_v27, %s5252_s7 }
 0x216   :  { %1077 = vrot.lane.b32.xlu1 %v5446_v24, %s5248_s2 }
 0x219   :  { %1079 = vrot.lane.b32.xlu0 %v5458_v27, %s5248_s2 }
 0x21a   :  { %1089 = vrot.lane.b32.xlu1 %v5446_v24, %s5253_s21 }
 0x21d   :  { %1091 = vrot.lane.b32.xlu0 %v5458_v27, %s5253_s21 }
 0x21e   :  { %1069 = vrot.lane.b32.xlu1 %v5468_v32, %s5252_s7 }
 0x221   :  { %475 = vrot.lane.b32.xlu0 %v5452_v25, %s5252_s7 }
 0x222   :  { %1081 = vrot.lane.b32.xlu1 %v5468_v32, %s5248_s2 }
 0x225   :  { %487 = vrot.lane.b32.xlu0 %v5452_v25, %s5248_s2 }
 0x226   :  { %1093 = vrot.lane.b32.xlu1 %v5468_v32, %s5253_s21 }
 0x229   :  { %499 = vrot.lane.b32.xlu0 %v5452_v25, %s5253_s21 }
 0x22a   :  { %477 = vrot.lane.b32.xlu1 %v5464_v29, %s5252_s7 }
 0x22d   :  { %1655 = vrot.lane.b32.xlu0 %v5460_v28, %s5252_s7 }
 0x22e   :  { %489 = vrot.lane.b32.xlu1 %v5464_v29, %s5248_s2 }
 0x231   :  { %1679 = vrot.lane.b32.xlu0 %v5460_v28, %s5253_s21 }
 0x232   :  { %501 = vrot.lane.b32.xlu1 %v5464_v29, %s5253_s21 }
 0x236   :  { %1657 = vrot.lane.b32.xlu1 %v5470_v33, %s5252_s7 }
 0x23a   :  { %1667 = vrot.lane.b32.xlu1 %v5460_v28, %s5248_s2 }
 0x23e   :  { %1669 = vrot.lane.b32.xlu1 %v5470_v33, %s5248_s2 }
 0x273   :  { %v472_v34 = vpop.permute.xlu0 %471 }
 0x274   :  { %v1076_v38 = vpop.permute.xlu1 %1075 }
 0x275   :  { %v1099_v14 = vcombine.low %v5440_v6, %v1076_v38  ;;  %v1100_v0 = vcombine.high %v5440_v6, %v1076_v38 }
 0x277   :  { %v484_v39 = vpop.permute.xlu0 %483  ;;  %v1107_v36 = vrot.slane %v1099_v14, %v5521_v46  ;;  %v1114_v40 = vrot.slane %v1100_v0, %v5521_v46 }
 0x278   :  { %v474_v42 = vpop.permute.xlu1 %473  ;;  %v507_v47 = vcombine.low %v5436_v5, %v484_v39  ;;  %v508_v53 = vcombine.high %v5436_v5, %v484_v39 }
 0x27a   :  { %v515_v55 = vrot.slane %v507_v47, %v5521_v46  ;;  %v522_v63 = vrot.slane %v508_v53, %v5521_v46 }
 0x27b   :  { %v496_v45 = vpop.permute.xlu0 %495 }
 0x27c   :  { %v523_v48 = vcombine.low %v472_v34, %v496_v45  ;;  %v486_v49 = vpop.permute.xlu1 %485  ;;  %v524_v50 = vcombine.high %v472_v34, %v496_v45 }
 0x27d   :  { %v575_v62 = vcombine.low %v5444_v23, %v486_v49  ;;  %v576_v10 = vcombine.high %v5444_v23, %v486_v49 }
 0x27e   :  { %v531_v52 = vrot.slane %v523_v48, %v5521_v46  ;;  %v538_v57 = vrot.slane %v524_v50, %v5521_v46 }
 0x27f   :  { %v1064_v54 = vpop.permute.xlu0 %1063  ;;  %v583_v13 = vrot.slane %v575_v62, %v5521_v46  ;;  %v590_v5 = vrot.slane %v576_v10, %v5521_v46 }
 0x280   :  { %v498_v56 = vpop.permute.xlu1 %497  ;;  %v539_v60 = vcombine.low %v515_v55, %v531_v52  ;;  %v540_v61 = vcombine.high %v515_v55, %v531_v52  ;;  %v555_v8 = vcombine.low %v522_v63, %v538_v57  ;;  %v556_v9 = vcombine.high %v522_v63, %v538_v57 }
 0x281   :  { %v591_v58 = vcombine.low %v474_v42, %v498_v56  ;;  %v592_v2 = vcombine.high %v474_v42, %v498_v56 }
 0x282   :  { %v547_v11 = vrot.slane %v539_v60, %v5529_v59  ;;  %v554_v12 = vrot.slane %v540_v61, %v5529_v59  ;;  %v563_v21 = vrot.slane %v555_v8, %v5529_v59  ;;  %v570_v22 = vrot.slane %v556_v9, %v5529_v59 }
 0x283   :  { %v1088_v3 = vpop.permute.xlu0 %1087  ;;  %v599_v4 = vrot.slane %v591_v58, %v5521_v46  ;;  %v606_v15 = vrot.slane %v592_v2, %v5521_v46 }
 0x284   :  { %v5534_v7 = vpop.permute.xlu1 %1065  ;;  %v1115_v19 = vcombine.low %v1064_v54, %v1088_v3  ;;  %v1116_v1 = vcombine.high %v1064_v54, %v1088_v3  ;;  %v779_v23 = vcombine.low %v547_v11, %v554_v12  ;;  %v4451_v34 = vcombine.high %v547_v11, %v554_v12 }
 0x285   :  { %v607_v17 = vcombine.low %v583_v13, %v599_v4  ;;  %v608_v18 = vcombine.high %v583_v13, %v599_v4  ;;  %v623_v37 = vcombine.low %v590_v5, %v606_v15  ;;  %v624_v38 = vcombine.high %v590_v5, %v606_v15 }
 0x286   :  { %v1123_v35 = vrot.slane %v1115_v19, %v5521_v46  ;;  %v1130_v6 = vrot.slane %v1116_v1, %v5521_v46  ;;  %v795_v45 = vcombine.low %v563_v21, %v570_v22  ;;  %v4452_v47 = vcombine.high %v563_v21, %v570_v22 }
 0x287   :  { %v5543_v16 = vpop.permute.xlu0 %1067  ;;  %v615_v42 = vrot.slane %v607_v17, %v5529_v59  ;;  %v622_v43 = vrot.slane %v608_v18, %v5529_v59  ;;  %v5555_v50 = vrot.slane %v779_v23, %v5521_v46  ;;  %v5558_v51 = vrot.slane %v4451_v34, %v5521_v46 }
 0x288   :  { %v1078_v20 = vpop.permute.xlu1 %1077  ;;  %v1131_v48 = vcombine.low %v1107_v36, %v1123_v35  ;;  %v1132_v49 = vcombine.high %v1107_v36, %v1123_v35  ;;  %v1147_v52 = vcombine.low %v1114_v40, %v1130_v6  ;;  %v1148_v53 = vcombine.high %v1114_v40, %v1130_v6 }
 0x289   :  { %v631_v54 = vrot.slane %v623_v37, %v5529_v59  ;;  %v638_v55 = vrot.slane %v624_v38, %v5529_v59  ;;  %v847_v58 = vcombine.low %v615_v42, %v622_v43  ;;  %v1167_v60 = vcombine.low %v5446_v24, %v1078_v20 }
 0x28a   :  { %v5566_v62 = vrot.slane %v795_v45, %v5521_v46  ;;  %v5569_v63 = vrot.slane %v4452_v47, %v5521_v46  ;;  %v1139_v2 = vrot.slane %v1131_v48, %v5529_v59  ;;  %v1146_v3 = vrot.slane %v1132_v49, %v5529_v59 }
 0x28b   :  { %v1080_v39 = vpop.permute.xlu0 %1079  ;;  %v1155_v8 = vrot.slane %v1147_v52, %v5529_v59  ;;  %v1162_v9 = vrot.slane %v1148_v53, %v5529_v59  ;;  %v1168_v10 = vcombine.high %v5446_v24, %v1078_v20  ;;  %v4453_v11 = vcombine.high %v615_v42, %v622_v43 }
 0x28c   :  { %v1090_v44 = vpop.permute.xlu1 %1089  ;;  %v863_v12 = vcombine.low %v631_v54, %v638_v55  ;;  %v854_v0 = vrot.slane %v847_v58, %v5521_v46  ;;  %v4454_v15 = vcombine.high %v631_v54, %v638_v55  ;;  %v1175_v17 = vrot.slane %v1167_v60, %v5521_v46 }
 0x28d   :  { %v1183_v56 = vcombine.low %v5534_v7, %v1090_v44  ;;  %v1184_v61 = vcombine.high %v5534_v7, %v1090_v44  ;;  %v811_v7 = vcombine.low %v5555_v50, %v5558_v51  ;;  %v1371_v1 = vcombine.low %v1139_v2, %v1146_v3 }
 0x28e   :  { %v1235_v24 = vcombine.low %v5458_v27, %v1080_v39  ;;  %v1236_v20 = vcombine.high %v5458_v27, %v1080_v39  ;;  %v4459_v22 = vcombine.high %v1139_v2, %v1146_v3  ;;  %v1387_v5 = vcombine.low %v1155_v8, %v1162_v9 }
 0x28f   :  { %v1092_v57 = vpop.permute.xlu0 %1091  ;;  %v1191_v13 = vrot.slane %v1183_v56, %v5521_v46  ;;  %v1198_v18 = vrot.slane %v1184_v61, %v5521_v46  ;;  %v4460_v23 = vcombine.high %v1155_v8, %v1162_v9  ;;  %v1182_v34 = vrot.slane %v1168_v10, %v5521_v46 }
 0x290   :  { %v5573_v4 = vpop.permute.xlu1 %1069  ;;  %v1251_v14 = vcombine.low %v5543_v16, %v1092_v57  ;;  %v1252_v21 = vcombine.high %v5543_v16, %v1092_v57  ;;  %v862_v35 = vrot.slane %v4453_v11, %v5521_v46  ;;  %v870_v40 = vrot.slane %v863_v12, %v5521_v46 }
 0x291   :  { %v1199_v6 = vcombine.low %v1175_v17, %v1191_v13  ;;  %v1200_v36 = vcombine.high %v1175_v17, %v1191_v13  ;;  %v878_v42 = vrot.slane %v4454_v15, %v5521_v46  ;;  %v1215_v27 = vcombine.low %v1182_v34, %v1198_v18 }
 0x292   :  { %v1259_v37 = vrot.slane %v1251_v14, %v5521_v46  ;;  %v827_v16 = vcombine.low %v5566_v62, %v5569_v63  ;;  %v5600_v39 = vrot.slane %v1371_v1, %v5521_v46  ;;  %v1243_v43 = vrot.slane %v1235_v24, %v5521_v46 }
 0x293   :  { %v5585_v19 = vpop.permute.xlu0 %475  ;;  %v1250_v44 = vrot.slane %v1236_v20, %v5521_v46  ;;  %v1266_v45 = vrot.slane %v1252_v21, %v5521_v46  ;;  %v5606_v47 = vrot.slane %v4459_v22, %v5521_v46  ;;  %v5609_v48 = vrot.slane %v1387_v5, %v5521_v46 }
 0x294   :  { %v5593_v38 = vpop.permute.xlu1 %1081  ;;  %v5612_v49 = vrot.slane %v4460_v23, %v5521_v46  ;;  %v1216_v52 = vcombine.high %v1182_v34, %v1198_v18  ;;  %v1207_v54 = vrot.slane %v1199_v6, %v5529_v59  ;;  %v1214_v55 = vrot.slane %v1200_v36, %v5529_v59 }
 0x295   :  { %v1267_v56 = vcombine.low %v1243_v43, %v1259_v37  ;;  %v879_v57 = vcombine.low %v854_v0, %v862_v35  ;;  %v1223_v58 = vrot.slane %v1215_v27, %v5529_v59  ;;  %v1268_v60 = vcombine.high %v1243_v43, %v1259_v37 }
 0x296   :  { %v5620_v61 = vrot.slane %v811_v7, %v5529_v59  ;;  %v5623_v2 = vrot.slane %v827_v16, %v5529_v59  ;;  %v1283_v3 = vcombine.low %v1250_v44, %v1266_v45  ;;  %v1284_v8 = vcombine.high %v1250_v44, %v1266_v45 }
 0x297   :  { %v5614_v53 = vpop.permute.xlu0 %487  ;;  %v5626_v9 = vrot.slane %v879_v57, %v5529_v59  ;;  %v895_v10 = vcombine.low %v870_v40, %v878_v42  ;;  %v812_v12 = vcombine.high %v5555_v50, %v5558_v51  ;;  %v828_v13 = vcombine.high %v5566_v62, %v5569_v63 }
 0x298   :  { %v1094_v11 = vpop.permute.xlu1 %1093  ;;  %v880_v14 = vcombine.high %v854_v0, %v862_v35  ;;  %v896_v15 = vcombine.high %v870_v40, %v878_v42  ;;  %v1230_v7 = vrot.slane %v1216_v52, %v5529_v59  ;;  %v1439_v17 = vcombine.low %v1207_v54, %v1214_v55 }
 0x299   :  { %v1275_v18 = vrot.slane %v1267_v56, %v5529_v59  ;;  %v5635_v1 = vrot.slane %v895_v10, %v5529_v59  ;;  %v5638_v24 = vrot.slane %v812_v12, %v5529_v59  ;;  %v5641_v20 = vrot.slane %v828_v13, %v5529_v59 }
 0x29a   :  { %v5644_v50 = vrot.slane %v880_v14, %v5529_v59  ;;  %v5647_v51 = vrot.slane %v896_v15, %v5529_v59  ;;  %v1282_v63 = vrot.slane %v1268_v60, %v5529_v59  ;;  %v1291_v0 = vrot.slane %v1283_v3, %v5529_v59 }
 0x29b   :  { %v500_v62 = vpop.permute.xlu0 %499  ;;  %v843_v21 = vcombine.low %v5620_v61, %v5623_v2  ;;  %v911_v22 = vcombine.low %v5626_v9, %v5635_v1  ;;  %v1298_v5 = vrot.slane %v1284_v8, %v5529_v59  ;;  %v845_v23 = vcombine.low %v5638_v24, %v5641_v20 }
 0x29c   :  { %v913_v34 = vcombine.low %v5644_v50, %v5647_v51  ;;  %v1319_v35 = vcombine.low %v5573_v4, %v1094_v11  ;;  %v4461_v6 = vcombine.high %v1207_v54, %v1214_v55  ;;  %v1455_v36 = vcombine.low %v1223_v58, %v1230_v7  ;;  %v5662_v42 = vpop.permute.xlu1 %477 }
 0x29d   :  { %v1051_v37 = vpack.c.bf16 %v911_v22, %v843_v21  ;;  %v659_v40 = vcombine.low %v5585_v19, %v500_v62  ;;  %v4462_v27 = vcombine.high %v1223_v58, %v1230_v7  ;;  %v1303_v16 = vcombine.low %v5468_v32, %v5593_v38 }
 0x29e   :  { %v1055_v43 = vpack.c.bf16 %v913_v34, %v845_v23  ;;  %v1320_v44 = vcombine.high %v5573_v4, %v1094_v11  ;;  %v1507_v45 = vcombine.low %v1275_v18, %v1282_v63  ;;  %v4463_v52 = vcombine.high %v1275_v18, %v1282_v63 }
 0x29f   :  { %4707 = vmatprep.mubr.msk.bf16.mxu1 %vm2247_vm0, %v1051_v37  ;;  %v643_v54 = vcombine.low %v5452_v25, %v5614_v53  ;;  %v660_v55 = vcombine.high %v5585_v19, %v500_v62  ;;  %v1446_v56 = vrot.slane %v1439_v17, %v5521_v46  ;;  %v1523_v57 = vcombine.low %v1291_v0, %v1298_v5 }
 0x2a0   :  { %v1304_v58 = vcombine.high %v5468_v32, %v5593_v38  ;;  %4723 = vmatprep.mubr.msk.bf16.mxu0 %vm2247_vm0, %v1055_v43  ;;  %v1327_v60 = vrot.slane %v1319_v35, %v5521_v46  ;;  %v1454_v4 = vrot.slane %v4461_v6, %v5521_v46  ;;  %v4464_v3 = vcombine.high %v1291_v0, %v1298_v5 }
 0x2a1   :  { %v644_v8 = vcombine.high %v5452_v25, %v5614_v53  ;;  %v667_v10 = vrot.slane %v659_v40, %v5521_v46  ;;  %v1462_v19 = vrot.slane %v1455_v36, %v5521_v46  ;;  %v1470_v11 = vrot.slane %v4462_v27, %v5521_v46  ;;  %v490_v53 = vpop.permute.xlu1 %489 }
 0x2a2   :  { %v1311_v12 = vrot.slane %v1303_v16, %v5521_v46  ;;  %v1334_v32 = vrot.slane %v1320_v44, %v5521_v46  ;;  %v5685_v38 = vrot.slane %v1507_v45, %v5521_v46  ;;  %v5688_v13 = vrot.slane %v4463_v52, %v5521_v46 }
 0x2a3   :  { %v651_v14 = vrot.slane %v643_v54, %v5521_v46  ;;  %v674_v25 = vrot.slane %v660_v55, %v5521_v46  ;;  %v5693_v15 = vrot.slane %v1523_v57, %v5521_v46  ;;  %v1318_v7 = vrot.slane %v1304_v58, %v5521_v46 }
 0x2a4   :  { %v1335_v17 = vcombine.low %v1311_v12, %v1327_v60  ;;  %v1336_v18 = vcombine.high %v1311_v12, %v1327_v60  ;;  %v5697_v62 = vrot.slane %v4464_v3, %v5521_v46  ;;  %v658_v63 = vrot.slane %v644_v8, %v5521_v46 }
 0x2a5   :  { %v675_v0 = vcombine.low %v651_v14, %v667_v10  ;;  %v676_v21 = vcombine.high %v651_v14, %v667_v10  ;;  %v1351_v22 = vcombine.low %v1318_v7, %v1334_v32  ;;  %v1352_v5 = vcombine.high %v1318_v7, %v1334_v32 }
 0x2a6   :  { %v711_v23 = vcombine.low %v5464_v29, %v490_v53  ;;  %v712_v34 = vcombine.high %v5464_v29, %v490_v53  ;;  %v691_v35 = vcombine.low %v658_v63, %v674_v25  ;;  %v692_v6 = vcombine.high %v658_v63, %v674_v25  ;;  %v502_v53 = vpop.permute.xlu1 %501 }
 0x2a7   :  { %v1403_v36 = vcombine.low %v5600_v39, %v5606_v47  ;;  %v1419_v37 = vcombine.low %v5609_v48, %v5612_v49  ;;  %v5707_v40 = vrot.slane %v1335_v17, %v5529_v59  ;;  %v1350_v27 = vrot.slane %v1336_v18, %v5529_v59 }
 0x2a8   :  { %v1471_v16 = vcombine.low %v1446_v56, %v1454_v4  ;;  %v1487_v43 = vcombine.low %v1462_v19, %v1470_v11  ;;  %v683_v44 = vrot.slane %v675_v0, %v5529_v59  ;;  %v690_v45 = vrot.slane %v676_v21, %v5529_v59 }
 0x2a9   :  { %v5713_v29 = vrot.slane %v1403_v36, %v5529_v59  ;;  %v5716_v52 = vrot.slane %v1419_v37, %v5529_v59  ;;  %v5719_v54 = vrot.slane %v1351_v22, %v5529_v59  ;;  %v5722_v55 = vrot.slane %v1352_v5, %v5529_v59 }
 0x2aa   :  { %v5725_v57 = vrot.slane %v1471_v16, %v5529_v59  ;;  %v5728_v58 = vrot.slane %v1487_v43, %v5529_v59  ;;  %v699_v60 = vrot.slane %v691_v35, %v5529_v59  ;;  %v706_v3 = vrot.slane %v692_v6, %v5529_v59 }
 0x2ab   :  { %v1435_v8 = vcombine.low %v5713_v29, %v5716_v52  ;;  %v1404_v10 = vcombine.high %v5600_v39, %v5606_v47  ;;  %v1420_v32 = vcombine.high %v5609_v48, %v5612_v49  ;;  %v1472_v14 = vcombine.high %v1446_v56, %v1454_v4 }
 0x2ac   :  { %v1503_v12 = vcombine.low %v5725_v57, %v5728_v58  ;;  %v1488_v25 = vcombine.high %v1462_v19, %v1470_v11  ;;  %v1575_v7 = vcombine.low %v5707_v40, %v1350_v27  ;;  %v915_v17 = vcombine.low %v683_v44, %v690_v45 }
 0x2ad   :  { %v4455_v18 = vcombine.high %v683_v44, %v690_v45  ;;  %v5742_v63 = vrot.slane %v1404_v10, %v5529_v59  ;;  %v5745_v21 = vrot.slane %v1420_v32, %v5529_v59  ;;  %v5748_v39 = vrot.slane %v1472_v14, %v5529_v59 }
 0x2ae   :  { %v1643_v0 = vpack.c.bf16 %v1503_v12, %v1435_v8  ;;  %v5751_v47 = vrot.slane %v1488_v25, %v5529_v59  ;;  %v4465_v48 = vcombine.high %v5707_v40, %v1350_v27  ;;  %v931_v49 = vcombine.low %v699_v60, %v706_v3 }
 0x2af   :  { %v727_v56 = vcombine.low %v5662_v42, %v502_v53  ;;  %v728_v4 = vcombine.high %v5662_v42, %v502_v53  ;;  %v4456_v19 = vcombine.high %v699_v60, %v706_v3  ;;  %v1437_v11 = vcombine.low %v5742_v63, %v5745_v21 }
 0x2b0   :  { %4787 = vmatprep.subr.msk.bf16.mxu1 %vm2247_vm0, %v1643_v0  ;;  %v1505_v22 = vcombine.low %v5748_v39, %v5751_v47  ;;  %v2255_v5 = vsel %vm2247_vm0, %v1643_v0, 0  ;;  %v719_v35 = vrot.slane %v711_v23, %v5521_v46  ;;  %v726_v6 = vrot.slane %v712_v34, %v5521_v46 }
 0x2b1   :  { %4704 = vmatpush3.bf16.xpose.msra.mxu1 %v2255_v5  ;;  %v735_v36 = vrot.slane %v727_v56, %v5521_v46  ;;  %v742_v42 = vrot.slane %v728_v4, %v5521_v46  ;;  %v1591_v37 = vcombine.low %v5719_v54, %v5722_v55  ;;  %v922_v40 = vrot.slane %v915_v17, %v5521_v46 }
 0x2b2   :  { %v930_v27 = vrot.slane %v4455_v18, %v5521_v46  ;;  %v1647_v16 = vpack.c.bf16 %v1505_v22, %v1437_v11  ;;  %v4466_v23 = vcombine.high %v5719_v54, %v5722_v55  ;;  %v938_v34 = vrot.slane %v931_v49, %v5521_v46 }
 0x2b3   :  { %v743_v43 = vcombine.low %v719_v35, %v735_v36  ;;  %v744_v44 = vcombine.high %v719_v35, %v735_v36  ;;  %v759_v45 = vcombine.low %v726_v6, %v742_v42  ;;  %v760_v60 = vcombine.high %v726_v6, %v742_v42 }
 0x2b4   :  { %v946_v3 = vrot.slane %v4456_v19, %v5521_v46  ;;  %4791 = vmatprep.subr.msk.bf16.mxu0 %vm2247_vm0, %v1647_v16  ;;  %v2377_v8 = vsel %vm2247_vm0, %v1647_v16, 0  ;;  %v1582_v25 = vrot.slane %v1575_v7, %v5521_v46  ;;  %v1590_v54 = vrot.slane %v4465_v48, %v5521_v46 }
 0x2b5   :  { %4720 = vmatpush3.bf16.xpose.msra.mxu0 %v2377_v8  ;;  %v751_v10 = vrot.slane %v743_v43, %v5529_v59  ;;  %v758_v12 = vrot.slane %v744_v44, %v5529_v59  ;;  %v767_v32 = vrot.slane %v759_v45, %v5529_v59  ;;  %v774_v14 = vrot.slane %v760_v60, %v5529_v59 }
 0x2b6   :  { %v947_v55 = vcombine.low %v922_v40, %v930_v27  ;;  %v948_v53 = vcombine.high %v922_v40, %v930_v27  ;;  %v963_v56 = vcombine.low %v938_v34, %v946_v3  ;;  %v964_v4 = vcombine.high %v938_v34, %v946_v3 }
 0x2b7   :  { %v983_v17 = vcombine.low %v751_v10, %v758_v12  ;;  %v4457_v18 = vcombine.high %v751_v10, %v758_v12  ;;  %v999_v0 = vcombine.low %v767_v32, %v774_v14  ;;  %v4458_v49 = vcombine.high %v767_v32, %v774_v14 }
 0x2b8   :  { %v1539_v19 = vcombine.low %v5685_v38, %v5688_v13  ;;  %v1555_v11 = vcombine.low %v5693_v15, %v5697_v62  ;;  %v1598_v35 = vrot.slane %v1591_v37, %v5521_v46  ;;  %v1606_v6 = vrot.slane %v4466_v23, %v5521_v46 }
 0x2b9   :  { %v990_v22 = vrot.slane %v983_v17, %v5521_v46  ;;  %v998_v7 = vrot.slane %v4457_v18, %v5521_v46  ;;  %v1006_v48 = vrot.slane %v999_v0, %v5521_v46  ;;  %v1014_v5 = vrot.slane %v4458_v49, %v5521_v46 }
 0x2ba   :  { %v5793_v36 = vrot.slane %v947_v55, %v5529_v59  ;;  %v1607_v42 = vcombine.low %v1582_v25, %v1590_v54  ;;  %v5796_v44 = vrot.slane %v948_v53, %v5529_v59  ;;  %v971_v45 = vrot.slane %v963_v56, %v5529_v59 }
 0x2bb   :  { %v1015_v40 = vcombine.low %v990_v22, %v998_v7  ;;  %v1016_v27 = vcombine.high %v990_v22, %v998_v7  ;;  %v1031_v16 = vcombine.low %v1006_v48, %v1014_v5  ;;  %v1032_v43 = vcombine.high %v1006_v48, %v1014_v5 }
 0x2bc   :  { %v978_v60 = vrot.slane %v964_v4, %v5529_v59  ;;  %v1547_v34 = vrot.slane %v1539_v19, %v5529_v59  ;;  %v1563_v8 = vrot.slane %v1555_v11, %v5529_v59  ;;  %v1615_v12 = vrot.slane %v1607_v42, %v5529_v59 }
 0x2bd   :  { %v1023_v37 = vrot.slane %v1015_v40, %v5529_v59  ;;  %v1030_v23 = vrot.slane %v1016_v27, %v5529_v59  ;;  %v1046_v3 = vrot.slane %v1032_v43, %v5529_v59  ;;  %v1039_v10 = vrot.slane %v1031_v16, %v5529_v59 }
 0x2be   :  { %v1623_v32 = vcombine.low %v1598_v35, %v1606_v6  ;;  %v1540_v14 = vcombine.high %v5685_v38, %v5688_v13  ;;  %v1556_v53 = vcombine.high %v5693_v15, %v5697_v62  ;;  %v1608_v17 = vcombine.high %v1582_v25, %v1590_v54 }
 0x2bf   :  { %v1049_v55 = vcombine.low %v1030_v23, %v1046_v3  ;;  %v1624_v18 = vcombine.high %v1598_v35, %v1606_v6  ;;  %v1436_v56 = vcombine.high %v5713_v29, %v5716_v52  ;;  %v1504_v4 = vcombine.high %v5725_v57, %v5728_v58 }
 0x2c0   :  { %v1631_v0 = vrot.slane %v1623_v32, %v5529_v59  ;;  %v1554_v49 = vrot.slane %v1540_v14, %v5529_v59  ;;  %v1570_v19 = vrot.slane %v1556_v53, %v5529_v59  ;;  %v1622_v38 = vrot.slane %v1608_v17, %v5529_v59 }
 0x2c1   :  { %v1638_v13 = vrot.slane %v1624_v18, %v5529_v59  ;;  %v981_v15 = vcombine.low %v5796_v44, %v978_v60  ;;  %v1571_v62 = vcombine.low %v1547_v34, %v1563_v8  ;;  %v1645_v54 = vpack.c.bf16 %v1504_v4, %v1436_v56  ;;  %v2243_v4 = vld [vmem:[#allocation7] sm:$0xff] }
 0x2c2   :  { %v1639_v25 = vcombine.low %v1615_v12, %v1631_v0  ;;  %v1573_v11 = vcombine.low %v1554_v49, %v1570_v19  ;;  %v979_v7 = vcombine.low %v5793_v36, %v971_v45  ;;  %v1047_v48 = vcombine.low %v1023_v37, %v1039_v10 }
 0x2c3   :  { %v1641_v22 = vcombine.low %v1622_v38, %v1638_v13  ;;  %v1056_v52 = vpack.c.bf16 %v1049_v55, %v981_v15  ;;  %v1572_v58 = vcombine.high %v1547_v34, %v1563_v8  ;;  %v1640_v35 = vcombine.high %v1615_v12, %v1631_v0  ;;  %v2244_v15 = vld [vmem:[#allocation7 + $0x8] sm:$0xff] }
 0x2c4   :  { %v1644_v29 = vpack.c.bf16 %v1639_v25, %v1571_v62  ;;  %v1052_v57 = vpack.c.bf16 %v1047_v48, %v979_v7  ;;  %v844_v42 = vcombine.high %v5620_v61, %v5623_v2  ;;  %v912_v40 = vcombine.high %v5626_v9, %v5635_v1 }
 0x2c5   :  { %v1648_v5 = vpack.c.bf16 %v1641_v22, %v1573_v11  ;;  %v1438_v27 = vcombine.high %v5742_v63, %v5745_v21  ;;  %v1646_v43 = vpack.c.bf16 %v1640_v35, %v1572_v58  ;;  %v1506_v34 = vcombine.high %v5748_v39, %v5751_v47 }
 0x2c6   :  { %4788 = vmatprep.subr.msk.bf16.mxu1 %vm2247_vm0, %v1644_v29  ;;  %v2258_v6 = vsel %vm2247_vm0, %v1644_v29, 0  ;;  %v980_v8 = vcombine.high %v5793_v36, %v971_v45  ;;  %v1053_v61 = vpack.c.bf16 %v912_v40, %v844_v42  ;;  %v1048_v2 = vcombine.high %v1023_v37, %v1039_v10 }
 0x2c7   :  { %4792 = vmatprep.subr.msk.bf16.mxu0 %vm2247_vm0, %v1648_v5  ;;  %4706 = vmatpush3.bf16.xpose.msra.mxu1 %v2258_v6  ;;  %v2380_v16 = vsel %vm2247_vm0, %v1648_v5, 0  ;;  %v846_v9 = vcombine.high %v5638_v24, %v5641_v20  ;;  %v1649_v1 = vpack.c.bf16 %v1506_v34, %v1438_v27  ;;  %v914_v63 = vcombine.high %v5644_v50, %v5647_v51  ;;  %v2245_v51 = vld [vmem:[#allocation7 + $0x10] sm:$0xff] }
 0x2c8   :  { %4722 = vmatpush3.bf16.xpose.msra.mxu0 %v2380_v16  ;;  %4789 = vmatprep.subr.msk.bf16.mxu1 %vm2247_vm0, %v1645_v54  ;;  %v1574_v21 = vcombine.high %v1554_v49, %v1570_v19  ;;  %v1054_v12 = vpack.c.bf16 %v1048_v2, %v980_v8  ;;  %v1642_v32 = vcombine.high %v1622_v38, %v1638_v13  ;;  %v2316_v37 = vsel %vm2247_vm0, %v1645_v54, 0 }
 0x2c9   :  { %v982_v14 = vcombine.high %v5796_v44, %v978_v60  ;;  %v1050_v39 = vcombine.high %v1030_v23, %v1046_v3  ;;  %v1057_v47 = vpack.c.bf16 %v914_v63, %v846_v9  ;;  %v2319_v24 = vsel %vm2247_vm0, %v1646_v43, 0  ;;  %v2246_v60 = vld [vmem:[#allocation7 + $0x18] sm:$0xff] }
 0x2ca   :  { %v1650_v36 = vpack.c.bf16 %v1642_v32, %v1574_v21  ;;  %v2438_v20 = vsel %vm2247_vm0, %v1649_v1, 0 }
 0x2cb   :  { %v1058_v45 = vpack.c.bf16 %v1050_v39, %v982_v14 }
 0x2cc   :  { %v2441_v50 = vsel %vm2247_vm0, %v1650_v36, 0 }
 0x2ce   :  { %4708 = vmatmul.mubr.msk.bf16.vlgmr.msra.gmra.mrb[4].mxu1 %vm2247_vm0, %v1052_v57 }
 0x2cf   :  { %4712 = vmatpush3.bf16.xpose.msra.mxu1 %v2316_v37  ;;  %4724 = vmatmul.mubr.msk.bf16.vlgmr.msra.gmra.mrb[8].mxu0 %vm2247_vm0, %v1056_v52  ;;  %v5932_v37 = vpop.permute.xlu1 %1657 }
 0x2d0   :  { %4790 = vmatprep.subr.msk.bf16.mxu1 %vm2247_vm0, %v1646_v43  ;;  %4715 = vmatprep.mubr.msk.bf16.mxu1 %vm2247_vm0, %v1053_v61 }
 0x2d7   :  { %4714 = vmatpush3.bf16.xpose.msra.mxu1 %v2319_v24  ;;  %v1656_v24 = vpop.permute.xlu0 %1655 }
 0x2d8   :  { %4793 = vmatprep.subr.msk.bf16.mxu1 %vm2247_vm0, %v1649_v1 }
 0x2de   :  { %4716 = vmatmul.mubr.msk.bf16.vlgmr.msra.gmra.mrb[8].mxu1 %vm2247_vm0, %v1054_v12 }
 0x2df   :  { %4728 = vmatpush3.bf16.xpose.msra.mxu1 %v2438_v20  ;;  %4731 = vmatprep.mubr.msk.bf16.mxu1 %vm2247_vm0, %v1057_v47  ;;  %v1668_v20 = vpop.permute.xlu1 %1667 }
 0x2e0   :  { %4794 = vmatprep.subr.msk.bf16.mxu1 %vm2247_vm0, %v1650_v36 }
 0x2e7   :  { %4730 = vmatpush3.bf16.xpose.msra.mxu1 %v2441_v50  ;;  %v1680_v50 = vpop.permute.xlu0 %1679 }
 0x2ee   :  { %4732 = vmatmul.mubr.msk.bf16.vlgmr.msra.gmra.mrb[12].mxu1 %vm2247_vm0, %v1058_v45 }
 0x3a1   :  { %v4709_v44 = vpop.f32.mrb[4].mxu1 }
 0x3a2   :  { %v5854_v23 = vadd.f32 %v4709_v44, %v2245_v51  ;;  %v4725_v3 = vpop.f32.mrb[8].mxu0  ;;  %v2294_v10 = vpop.f32.mrb[5].mxu1 }
 0x3a3   :  { %v2416_v55 = vpop.f32.mrb[9].mxu0  ;;  %v4710_v53 = vpop.f32.mrb[6].mxu1  ;;  %v5856_v17 = vadd.f32 %v4725_v3, %v2245_v51  ;;  %v5866_v62 = vadd.f32 %v2294_v10, %v2243_v4 }
 0x3a4   :  { %v5858_v18 = vadd.f32 %v4710_v53, %v2246_v60  ;;  %v4726_v0 = vpop.f32.mrb[10].mxu0  ;;  %v2297_v49 = vpop.f32.mrb[7].mxu1  ;;  %v2498_v56 = vsel %vm2247_vm0, %v5854_v23, -inf  ;;  %v5874_v22 = vadd.f32 %v2416_v55, %v2243_v4 }
 0x3a5   :  { %v2419_v19 = vpop.f32.mrb[11].mxu0  ;;  %2499 = vmax.xlane.f32.xlu0 %v2498_v56  ;;  %v5862_v38 = vadd.f32 %v4726_v0, %v2246_v60  ;;  %v2522_v25 = vsel %vm2247_vm0, %v5856_v17, -inf  ;;  %v5870_v54 = vadd.f32 %v2297_v49, %v2244_v15  ;;  %v2492_v7 = vsel %vm2247_vm0, %v5866_v62, -inf }
 0x3a6   :  { %v2501_v13 = vsel %vm2247_vm0, %v5858_v18, -inf  ;;  %v5878_v48 = vadd.f32 %v2419_v19, %v2244_v15  ;;  %v2516_v52 = vsel %vm2247_vm0, %v5874_v22, -inf }
 0x3a7   :  { %2502 = vmax.xlane.f32.xlu1 %v2501_v13  ;;  %v2525_v11 = vsel %vm2247_vm0, %v5862_v38, -inf  ;;  %v2495_v29 = vsel %vm2247_vm0, %v5870_v54, -inf }
 0x3a8   :  { %v2519_v35 = vsel %vm2247_vm0, %v5878_v48, -inf }
 0x3a9   :  { %2523 = vmax.xlane.f32.xlu0 %v2522_v25  ;;  %v1691_v25 = vcombine.low %v5460_v28, %v1668_v20 }
 0x3ab   :  { %2526 = vmax.xlane.f32.xlu1 %v2525_v11 }
 0x3ad   :  { %2493 = vmax.xlane.f32.xlu0 %v2492_v7  ;;  %v1707_v7 = vcombine.low %v1656_v24, %v1680_v50 }
 0x3af   :  { %2496 = vmax.xlane.f32.xlu1 %v2495_v29  ;;  %v1692_v29 = vcombine.high %v5460_v28, %v1668_v20  ;;  %v1715_v28 = vrot.slane %v1707_v7, %v5521_v46 }
 0x3b1   :  { %v4717_v5 = vpop.f32.mrb[8].mxu1  ;;  %2517 = vmax.xlane.f32.xlu0 %v2516_v52 }
 0x3b2   :  { %v5884_v57 = vadd.f32 %v4717_v5, %v2245_v51  ;;  %v2355_v58 = vpop.f32.mrb[9].mxu1 }
 0x3b3   :  { %v4718_v6 = vpop.f32.mrb[10].mxu1  ;;  %2520 = vmax.xlane.f32.xlu1 %v2519_v35  ;;  %v5888_v42 = vadd.f32 %v2355_v58, %v2243_v4  ;;  %v1699_v35 = vrot.slane %v1691_v25, %v5521_v46 }
 0x3b4   :  { %v5890_v40 = vadd.f32 %v4718_v6, %v2246_v60  ;;  %v2358_v27 = vpop.f32.mrb[11].mxu1  ;;  %v2510_v16 = vsel %vm2247_vm0, %v5884_v57, -inf }
 0x3b5   :  { %2511 = vmax.xlane.f32.xlu0 %v2510_v16  ;;  %v5896_v34 = vadd.f32 %v2358_v27, %v2244_v15  ;;  %v2504_v8 = vsel %vm2247_vm0, %v5888_v42, -inf  ;;  %v1706_v16 = vrot.slane %v1692_v29, %v5521_v46 }
 0x3b6   :  { %v2513_v43 = vsel %vm2247_vm0, %v5890_v40, -inf }
 0x3b7   :  { %2514 = vmax.xlane.f32.xlu1 %v2513_v43  ;;  %v2507_v61 = vsel %vm2247_vm0, %v5896_v34, -inf }
 0x3b9   :  { %2505 = vmax.xlane.f32.xlu0 %v2504_v8 }
 0x3bd   :  { %2508 = vmax.xlane.f32.xlu0 %v2507_v61 }
 0x3c1   :  { %v4733_v2 = vpop.f32.mrb[12].mxu1 }
 0x3c2   :  { %v5902_v9 = vadd.f32 %v4733_v2, %v2245_v51  ;;  %v2477_v1 = vpop.f32.mrb[13].mxu1  ;;  %v5934_v51 = vpop.permute.xlu1 %1669 }
 0x3c3   :  { %v4734_v63 = vpop.f32.mrb[14].mxu1  ;;  %v5904_v21 = vadd.f32 %v2477_v1, %v2243_v4 }
 0x3c4   :  { %v5906_v12 = vadd.f32 %v4734_v63, %v2246_v60  ;;  %v2480_v32 = vpop.f32.mrb[15].mxu1  ;;  %v2534_v14 = vsel %vm2247_vm0, %v5902_v9, -inf }
 0x3c5   :  { %2535 = vmax.xlane.f32.xlu0 %v2534_v14  ;;  %v5910_v39 = vadd.f32 %v2480_v32, %v2244_v15  ;;  %v2528_v36 = vsel %vm2247_vm0, %v5904_v21, -inf  ;;  %v1723_v32 = vcombine.low %v1699_v35, %v1715_v28 }
 0x3c6   :  { %v2537_v47 = vsel %vm2247_vm0, %v5906_v12, -inf }
 0x3c7   :  { %2538 = vmax.xlane.f32.xlu1 %v2537_v47  ;;  %v2531_v45 = vsel %vm2247_vm0, %v5910_v39, -inf }
 0x3c9   :  { %2529 = vmax.xlane.f32.xlu0 %v2528_v36 }
 0x3cb   :  { %2532 = vmax.xlane.f32.xlu1 %v2531_v45 }
 0x3dc   :  { %1681 = vrot.lane.b32.xlu1 %v5470_v33, %s5253_s21 }
 0x3df   :  { %1659 = vrot.lane.b32.xlu0 %v5454_v26, %s5252_s7 }
 0x3e0   :  { %1661 = vrot.lane.b32.xlu1 %v5466_v31, %s5252_s7 }
 0x3e3   :  { %1671 = vrot.lane.b32.xlu0 %v5454_v26, %s5248_s2 }
 0x3e4   :  { %1673 = vrot.lane.b32.xlu1 %v5466_v31, %s5248_s2 }
 0x3e7   :  { %1683 = vrot.lane.b32.xlu0 %v5454_v26, %s5253_s21 }
 0x3e8   :  { %1685 = vrot.lane.b32.xlu1 %v5466_v31, %s5253_s21 }
 0x432   :  { %v2500_v44 = vpop.xlane.xlu0 %2499 }
 0x433   :  { %v2542_v60 = vsub.f32 %v5854_v23, %v2500_v44 }
 0x434   :  { %v2503_v3 = vpop.xlane.xlu1 %2502 }
 0x435   :  { %v2560_v10 = vmul.f32 1.442695, %v2542_v60  ;;  %v2543_v55 = vsub.f32 %v5858_v18, %v2503_v3 }
 0x436   :  { %v2524_v53 = vpop.xlane.xlu0 %2523 }
 0x437   :  { %4974 = vpow2.f32 %v2560_v10  ;;  %v2562_v0 = vmul.f32 1.442695, %v2543_v55  ;;  %v2550_v61 = vsub.f32 %v5856_v17, %v2524_v53  ;;  %v1731_v10 = vrot.slane %v1723_v32, %v5529_v59 }
 0x438   :  { %v5938_v49 = vpop.xlane.xlu1 %2526 }
 0x439   :  { %4976 = vpow2.f32 %v2562_v0 }
 0x43a   :  { %v2494_v56 = vpop.xlane.xlu0 %2493 }
 0x43b   :  { %v2540_v4 = vsub.f32 %v5866_v62, %v2494_v56  ;;  %v1708_v62 = vcombine.high %v1656_v24, %v1680_v50  ;;  %v2576_v50 = vmul.f32 1.442695, %v2550_v61 }
 0x43c   :  { %v2497_v19 = vpop.xlane.xlu1 %2496 }
 0x43d   :  { %v2556_v13 = vmul.f32 1.442695, %v2540_v4  ;;  %v2541_v15 = vsub.f32 %v5870_v54, %v2497_v19  ;;  %v1722_v63 = vrot.slane %v1708_v62, %v5521_v46  ;;  %v2551_v4 = vsub.f32 %v5862_v38, %v5938_v49 }
 0x43e   :  { %v2518_v23 = vpop.xlane.xlu0 %2517 }
 0x43f   :  { %4978 = vpow2.f32 %v2556_v13  ;;  %v2558_v11 = vmul.f32 1.442695, %v2541_v15  ;;  %v2548_v18 = vsub.f32 %v5874_v22, %v2518_v23  ;;  %v1739_v45 = vcombine.low %v1706_v16, %v1722_v63 }
 0x440   :  { %v2521_v52 = vpop.xlane.xlu1 %2520  ;;  %v1740_v24 = vcombine.high %v1706_v16, %v1722_v63  ;;  %v2578_v7 = vmul.f32 1.442695, %v2551_v4 }
 0x441   :  { %v5945_v5 = vpop.eup %4974  ;;  %4980 = vpow2.f32 %v2558_v11  ;;  %v2572_v58 = vmul.f32 1.442695, %v2548_v18  ;;  %v2549_v17 = vsub.f32 %v5878_v48, %v2521_v52  ;;  %v1747_v53 = vrot.slane %v1739_v45, %v5529_v59 }
 0x442   :  { %v2512_v6 = vpop.xlane.xlu0 %2511  ;;  %v2594_v54 = vsel %vm2247_vm0, %v5945_v5, 0.0  ;;  %v1754_v48 = vrot.slane %v1740_v24, %v5529_v59  ;;  %v1759_v24 = vcombine.low %v5470_v33, %v5934_v51 }
 0x443   :  { %v5950_v27 = vpop.eup %4976  ;;  %4982 = vpow2.f32 %v2572_v58  ;;  %v2546_v22 = vsub.f32 %v5884_v57, %v2512_v6  ;;  %2595 = vadd.xlane.f32.xlu0 %v2594_v54  ;;  %v1724_v57 = vcombine.high %v1699_v35, %v1715_v28  ;;  %v2574_v19 = vmul.f32 1.442695, %v2549_v17 }
 0x444   :  { %v2515_v43 = vpop.xlane.xlu1 %2514  ;;  %v2597_v8 = vsel %vm2247_vm0, %v5950_v27, 0.0  ;;  %v1979_v23 = vcombine.low %v1747_v53, %v1754_v48  ;;  %v4468_v11 = vcombine.high %v1747_v53, %v1754_v48  ;;  %v1767_v48 = vrot.slane %v1759_v24, %v5521_v46 }
 0x445   :  { %v2568_v2 = vmul.f32 1.442695, %v2546_v22  ;;  %v2547_v1 = vsub.f32 %v5890_v40, %v2515_v43  ;;  %2598 = vadd.xlane.f32.xlu1 %v2597_v8  ;;  %v1738_v55 = vrot.slane %v1724_v57, %v5529_v59 }
 0x446   :  { %v2506_v14 = vpop.xlane.xlu0 %2505  ;;  %v1986_v35 = vrot.slane %v1979_v23, %v5521_v46  ;;  %v1994_v6 = vrot.slane %v4468_v11, %v5521_v46 }
 0x447   :  { %4984 = vpow2.f32 %v2568_v2  ;;  %v2570_v47 = vmul.f32 1.442695, %v2547_v1  ;;  %v2544_v36 = vsub.f32 %v5888_v42, %v2506_v14  ;;  %v1963_v15 = vcombine.low %v1731_v10, %v1738_v55 }
 0x448   :  { %v4467_v25 = vcombine.high %v1731_v10, %v1738_v55  ;;  %v2011_v14 = vcombine.low %v1986_v35, %v1994_v6 }
 0x449   :  { %v5961_v20 = vpop.eup %4978  ;;  %4986 = vpow2.f32 %v2570_v47  ;;  %v2564_v44 = vmul.f32 1.442695, %v2544_v36  ;;  %v1970_v52 = vrot.slane %v1963_v15, %v5521_v46  ;;  %v2012_v47 = vcombine.high %v1986_v35, %v1994_v6 }
 0x44a   :  { %v2509_v40 = vpop.xlane.xlu0 %2508  ;;  %v2588_v60 = vsel %vm2247_vm0, %v5961_v20, 0.0  ;;  %v1978_v58 = vrot.slane %v4467_v25, %v5521_v46  ;;  %v6019_v55 = vrot.slane %v2011_v14, %v5529_v59 }
 0x44b   :  { %v5966_v3 = vpop.eup %4980  ;;  %4988 = vpow2.f32 %v2564_v44  ;;  %v2545_v42 = vsub.f32 %v5896_v34, %v2509_v40  ;;  %2589 = vadd.xlane.f32.xlu0 %v2588_v60 }
 0x44c   :  { %v2591_v0 = vsel %vm2247_vm0, %v5966_v3, 0.0  ;;  %4990 = vpow2.f32 %v2576_v50  ;;  %v1995_v63 = vcombine.low %v1970_v52, %v1978_v58  ;;  %v1996_v57 = vcombine.high %v1970_v52, %v1978_v58 }
 0x44d   :  { %v5975_v56 = vpop.eup %4982  ;;  %v2566_v13 = vmul.f32 1.442695, %v2545_v42  ;;  %2592 = vadd.xlane.f32.xlu1 %v2591_v0  ;;  %v1760_v50 = vcombine.high %v5470_v33, %v5934_v51  ;;  %v6025_v51 = vrot.slane %v2012_v47, %v5529_v59 }
 0x44e   :  { %v2612_v34 = vsel %vm2247_vm0, %v5975_v56, 0.0  ;;  %v6022_v33 = vrot.slane %v1996_v57, %v5529_v59 }
 0x44f   :  { %4992 = vpow2.f32 %v2566_v13  ;;  %2613 = vadd.xlane.f32.xlu0 %v2612_v34  ;;  %v1774_v0 = vrot.slane %v1760_v50, %v5521_v46 }
 0x450   :  { %4994 = vpow2.f32 %v2574_v19 }
 0x451   :  { %v5981_v18 = vpop.eup %4984  ;;  %4996 = vpow2.f32 %v2578_v7 }
 0x452   :  { %v2536_v29 = vpop.xlane.xlu0 %2535  ;;  %v2606_v38 = vsel %vm2247_vm0, %v5981_v18, 0.0 }
 0x453   :  { %v5985_v49 = vpop.eup %4986  ;;  %v2554_v62 = vsub.f32 %v5902_v9, %v2536_v29  ;;  %2607 = vadd.xlane.f32.xlu0 %v2606_v38  ;;  %v2029_v29 = vcombine.low %v6022_v33, %v6025_v51 }
 0x454   :  { %v2539_v54 = vpop.xlane.xlu1 %2538  ;;  %v2609_v22 = vsel %vm2247_vm0, %v5985_v49, 0.0 }
 0x455   :  { %v5994_v28 = vpop.eup %4988  ;;  %v2584_v16 = vmul.f32 1.442695, %v2554_v62  ;;  %v2555_v43 = vsub.f32 %v5906_v12, %v2539_v54  ;;  %2610 = vadd.xlane.f32.xlu1 %v2609_v22 }
 0x456   :  { %v2530_v8 = vpop.xlane.xlu0 %2529  ;;  %v2600_v9 = vsel %vm2247_vm0, %v5994_v28, 0.0  ;;  %v5999_v61 = vpop.eup %4990 }
 0x457   :  { %4998 = vpow2.f32 %v2584_v16  ;;  %v2586_v2 = vmul.f32 1.442695, %v2555_v43  ;;  %v2552_v1 = vsub.f32 %v5904_v21, %v2530_v8  ;;  %2601 = vadd.xlane.f32.xlu0 %v2600_v9  ;;  %v2618_v21 = vsel %vm2247_vm0, %v5999_v61, 0.0 }
 0x458   :  { %v2533_v32 = vpop.xlane.xlu1 %2532  ;;  %v2030_v16 = vcombine.high %v6022_v33, %v6025_v51 }
 0x459   :  { %v6002_v36 = vpop.eup %4992  ;;  %5000 = vpow2.f32 %v2586_v2  ;;  %v2580_v12 = vmul.f32 1.442695, %v2552_v1  ;;  %v2553_v45 = vsub.f32 %v5910_v39, %v2533_v32  ;;  %v6016_v39 = vrot.slane %v1995_v63, %v5529_v59 }
 0x45a   :  { %v1660_v17 = vpop.permute.xlu0 %1659  ;;  %v2603_v44 = vsel %vm2247_vm0, %v6002_v36, 0.0  ;;  %v6013_v40 = vpop.eup %4994 }
 0x45b   :  { %v2582_v60 = vmul.f32 1.442695, %v2553_v45  ;;  %2619 = vadd.xlane.f32.xlu0 %v2618_v21  ;;  %2604 = vadd.xlane.f32.xlu1 %v2603_v44  ;;  %5002 = vpow2.f32 %v2580_v12  ;;  %v2615_v19 = vsel %vm2247_vm0, %v6013_v40, 0.0  ;;  %v6033_v13 = vpop.eup %4996  ;;  %v2027_v11 = vcombine.low %v6016_v39, %v6019_v55 }
 0x45c   :  { %v1682_v10 = vpop.permute.xlu1 %1681  ;;  %v2028_v7 = vcombine.high %v6016_v39, %v6019_v55  ;;  %v2621_v22 = vsel %vm2247_vm0, %v6033_v13, 0.0 }
 0x45d   :  { %v1775_v42 = vcombine.low %v5932_v37, %v1682_v10  ;;  %v1776_v53 = vcombine.high %v5932_v37, %v1682_v10  ;;  %5004 = vpow2.f32 %v2582_v60 }
 0x45e   :  { %v1672_v4 = vpop.permute.xlu0 %1671 }
 0x45f   :  { %v1783_v34 = vrot.slane %v1775_v42, %v5521_v46  ;;  %v1790_v15 = vrot.slane %v1776_v53, %v5521_v46  ;;  %v1827_v25 = vcombine.low %v5454_v26, %v1672_v4  ;;  %v1828_v23 = vcombine.high %v5454_v26, %v1672_v4  ;;  %2616 = vadd.xlane.f32.xlu1 %v2615_v19 }
 0x460   :  { %v6039_v37 = vpop.permute.xlu1 %1661 }
 0x461   :  { %v6047_v38 = vpop.eup %4998  ;;  %v1791_v52 = vcombine.low %v1767_v48, %v1783_v34  ;;  %v1792_v58 = vcombine.high %v1767_v48, %v1783_v34  ;;  %v1807_v62 = vcombine.low %v1774_v0, %v1790_v15  ;;  %v1808_v35 = vcombine.high %v1774_v0, %v1790_v15 }
 0x462   :  { %v1835_v26 = vrot.slane %v1827_v25, %v5521_v46  ;;  %v1842_v6 = vrot.slane %v1828_v23, %v5521_v46  ;;  %v1684_v54 = vpop.permute.xlu0 %1683  ;;  %v2630_v47 = vsel %vm2247_vm0, %v6047_v38, 0.0 }
 0x463   :  { %v6055_v43 = vpop.eup %5000  ;;  %v1799_v8 = vrot.slane %v1791_v52, %v5529_v59  ;;  %v1806_v9 = vrot.slane %v1792_v58, %v5529_v59  ;;  %v1815_v2 = vrot.slane %v1807_v62, %v5529_v59  ;;  %v1822_v1 = vrot.slane %v1808_v35, %v5529_v59  ;;  %2622 = vadd.xlane.f32.xlu1 %v2621_v22 }
 0x464   :  { %v1843_v63 = vcombine.low %v1660_v17, %v1684_v54  ;;  %v1844_v32 = vcombine.high %v1660_v17, %v1684_v54  ;;  %v1674_v14 = vpop.permute.xlu1 %1673  ;;  %v2633_v57 = vsel %vm2247_vm0, %v6055_v43, 0.0 }
 0x465   :  { %v2031_v12 = vcombine.low %v1799_v8, %v1806_v9  ;;  %v4469_v45 = vcombine.high %v1799_v8, %v1806_v9  ;;  %v2047_v24 = vcombine.low %v1815_v2, %v1822_v1  ;;  %v4470_v50 = vcombine.high %v1815_v2, %v1822_v1  ;;  %v6065_v21 = vpop.eup %5002 }
 0x466   :  { %v1851_v44 = vrot.slane %v1843_v63, %v5521_v46  ;;  %v1858_v60 = vrot.slane %v1844_v32, %v5521_v46  ;;  %v1895_v10 = vcombine.low %v5466_v31, %v1674_v14  ;;  %v1896_v17 = vcombine.high %v5466_v31, %v1674_v14 }
 0x467   :  { %v2038_v42 = vrot.slane %v2031_v12, %v5521_v46  ;;  %v2046_v53 = vrot.slane %v4469_v45, %v5521_v46  ;;  %v6074_v48 = vrot.slane %v2047_v24, %v5521_v46  ;;  %v6077_v0 = vrot.slane %v4470_v50, %v5521_v46  ;;  %2634 = vadd.xlane.f32.xlu1 %v2633_v57  ;;  %v6079_v4 = vpop.eup %5004 }
 0x468   :  { %v1859_v19 = vcombine.low %v1835_v26, %v1851_v44  ;;  %v1860_v34 = vcombine.high %v1835_v26, %v1851_v44  ;;  %v1875_v15 = vcombine.low %v1842_v6, %v1858_v60  ;;  %v1876_v25 = vcombine.high %v1842_v6, %v1858_v60  ;;  %v1686_v23 = vpop.permute.xlu1 %1685 }
 0x469   :  { %v1903_v31 = vrot.slane %v1895_v10, %v5521_v46  ;;  %v1910_v52 = vrot.slane %v1896_v17, %v5521_v46  ;;  %v2624_v58 = vsel %vm2247_vm0, %v6065_v21, 0.0  ;;  %v1911_v62 = vcombine.low %v6039_v37, %v1686_v23 }
 0x46a   :  { %v1867_v35 = vrot.slane %v1859_v19, %v5529_v59  ;;  %v1874_v54 = vrot.slane %v1860_v34, %v5529_v59  ;;  %v1883_v22 = vrot.slane %v1875_v15, %v5529_v59  ;;  %v1890_v26 = vrot.slane %v1876_v25, %v5529_v59  ;;  %2625 = vadd.xlane.f32.xlu0 %v2624_v58 }
 0x46b   :  { %v1912_v6 = vcombine.high %v6039_v37, %v1686_v23  ;;  %v1919_v8 = vrot.slane %v1911_v62, %v5521_v46  ;;  %v2627_v9 = vsel %vm2247_vm0, %v6079_v4, 0.0  ;;  %v2063_v2 = vcombine.low %v2038_v42, %v2046_v53 }
 0x46c   :  { %v2099_v1 = vcombine.low %v1867_v35, %v1874_v54  ;;  %v4471_v63 = vcombine.high %v1867_v35, %v1874_v54  ;;  %v2115_v32 = vcombine.low %v1883_v22, %v1890_v26  ;;  %v4472_v14 = vcombine.high %v1883_v22, %v1890_v26 }
 0x46d   :  { %v1926_v57 = vrot.slane %v1912_v6, %v5521_v46  ;;  %v1927_v12 = vcombine.low %v1903_v31, %v1919_v8  ;;  %v1928_v45 = vcombine.high %v1903_v31, %v1919_v8  ;;  %v2071_v24 = vrot.slane %v2063_v2, %v5529_v59 }
 0x46e   :  { %v2106_v50 = vrot.slane %v2099_v1, %v5521_v46  ;;  %v2114_v37 = vrot.slane %v4471_v63, %v5521_v46  ;;  %v2122_v44 = vrot.slane %v2115_v32, %v5521_v46  ;;  %v2130_v60 = vrot.slane %v4472_v14, %v5521_v46  ;;  %2628 = vadd.xlane.f32.xlu0 %v2627_v9 }
 0x46f   :  { %v1935_v10 = vrot.slane %v1927_v12, %v5529_v59  ;;  %v1942_v17 = vrot.slane %v1928_v45, %v5529_v59  ;;  %v1943_v19 = vcombine.low %v1910_v52, %v1926_v57  ;;  %v1944_v34 = vcombine.high %v1910_v52, %v1926_v57 }
 0x470   :  { %v2079_v15 = vcombine.low %v6074_v48, %v6077_v0  ;;  %v2131_v25 = vcombine.low %v2106_v50, %v2114_v37  ;;  %v2147_v23 = vcombine.low %v2122_v44, %v2130_v60  ;;  %v2064_v31 = vcombine.high %v2038_v42, %v2046_v53 }
 0x471   :  { %v1951_v58 = vrot.slane %v1943_v19, %v5529_v59  ;;  %v1958_v62 = vrot.slane %v1944_v34, %v5529_v59  ;;  %v2167_v35 = vcombine.low %v1935_v10, %v1942_v17  ;;  %v4473_v54 = vcombine.high %v1935_v10, %v1942_v17 }
 0x472   :  { %2631 = vadd.xlane.f32.xlu0 %v2630_v47  ;;  %v2087_v22 = vrot.slane %v2079_v15, %v5529_v59  ;;  %v2139_v26 = vrot.slane %v2131_v25, %v5529_v59  ;;  %v2155_v6 = vrot.slane %v2147_v23, %v5529_v59  ;;  %v2078_v52 = vrot.slane %v2064_v31, %v5529_v59 }
 0x473   :  { %v2174_v8 = vrot.slane %v2167_v35, %v5521_v46  ;;  %v2182_v9 = vrot.slane %v4473_v54, %v5521_v46  ;;  %v2183_v42 = vcombine.low %v1951_v58, %v1958_v62  ;;  %v4474_v53 = vcombine.high %v1951_v58, %v1958_v62 }
 0x474   :  { %v2095_v2 = vcombine.low %v2071_v24, %v2087_v22  ;;  %v2096_v1 = vcombine.high %v2071_v24, %v2087_v22  ;;  %v2163_v63 = vcombine.low %v2139_v26, %v2155_v6  ;;  %v2164_v32 = vcombine.high %v2139_v26, %v2155_v6 }
 0x475   :  { %v2190_v47 = vrot.slane %v2183_v42, %v5521_v46  ;;  %v2198_v14 = vrot.slane %v4474_v53, %v5521_v46  ;;  %v2199_v57 = vcombine.low %v2174_v8, %v2182_v9  ;;  %v2080_v12 = vcombine.high %v6074_v48, %v6077_v0 }
 0x476   :  { %v2235_v45 = vpack.c.bf16 %v2095_v2, %v2027_v11  ;;  %v2237_v10 = vpack.c.bf16 %v2096_v1, %v2028_v7  ;;  %v2132_v17 = vcombine.high %v2106_v50, %v2114_v37  ;;  %v2148_v24 = vcombine.high %v2122_v44, %v2130_v60 }
 0x477   :  { %v2207_v19 = vrot.slane %v2199_v57, %v5529_v59  ;;  %v2215_v34 = vcombine.low %v2190_v47, %v2198_v14  ;;  %v2094_v15 = vrot.slane %v2080_v12, %v5529_v59  ;;  %v2200_v25 = vcombine.high %v2174_v8, %v2182_v9 }
 0x478   :  { %4735 = vmatprep.subr.bf16.mxu0 %v2235_v45  ;;  %4743 = vmatprep.subr.bf16.mxu1 %v2237_v10  ;;  %v2146_v48 = vrot.slane %v2132_v17, %v5529_v59  ;;  %v2162_v0 = vrot.slane %v2148_v24, %v5529_v59  ;;  %v2216_v23 = vcombine.high %v2190_v47, %v2198_v14 }
 0x479   :  { %4736 = vmatpush3.bf16.msra.mxu0 %v2235_v45  ;;  %4744 = vmatpush3.bf16.msra.mxu1 %v2237_v10  ;;  %v2223_v39 = vrot.slane %v2215_v34, %v5529_v59  ;;  %v2097_v55 = vcombine.low %v2078_v52, %v2094_v15  ;;  %v2098_v11 = vcombine.high %v2078_v52, %v2094_v15 }
 0x47a   :  { %v2165_v7 = vcombine.low %v2146_v48, %v2162_v0  ;;  %v2214_v50 = vrot.slane %v2200_v25, %v5529_v59  ;;  %v2230_v37 = vrot.slane %v2216_v23, %v5529_v59  ;;  %v2166_v44 = vcombine.high %v2146_v48, %v2162_v0 }
 0x47b   :  { %v2231_v60 = vcombine.low %v2207_v19, %v2223_v39  ;;  %v2232_v31 = vcombine.high %v2207_v19, %v2223_v39  ;;  %v2239_v58 = vpack.c.bf16 %v2097_v55, %v2029_v29  ;;  %v6135_v62 = vpack.c.bf16 %v2098_v11, %v2030_v16 }
 0x47c   :  { %v2233_v35 = vcombine.low %v2214_v50, %v2230_v37  ;;  %v2234_v54 = vcombine.high %v2214_v50, %v2230_v37 }
 0x47d   :  { %v2236_v22 = vpack.c.bf16 %v2231_v60, %v2163_v63  ;;  %v2238_v26 = vpack.c.bf16 %v2232_v31, %v2164_v32 }
 0x47e   :  { %v2240_v6 = vpack.c.bf16 %v2233_v35, %v2165_v7  ;;  %v6137_v52 = vpack.c.bf16 %v2234_v54, %v2166_v44 }
 0x47f   :  { %4737 = vmatprep.subr.bf16.mxu0 %v2236_v22  ;;  %4745 = vmatprep.subr.bf16.mxu1 %v2238_v26 }
 0x480   :  { %4738 = vmatpush3.bf16.msra.mxu0 %v2236_v22  ;;  %4746 = vmatpush3.bf16.msra.mxu1 %v2238_v26 }
 0x481   :  { %4751 = vmatprep.subr.bf16.mxu0 %v2239_v58  ;;  %4759 = vmatprep.subr.bf16.mxu1 %v6135_v62 }
 0x4d0   :  { %v2596_v29 = vpop.xlane.xlu0 %2595 }
 0x4d2   :  { %v2599_v8 = vpop.xlane.xlu1 %2598 }
 0x4d3   :  { %5006 = vrcp.f32 %v2599_v8  ;;  %v4879_v8 = vld [vmem:[#allocation10 + $0x8] sm:$0xff]  }
 0x4d8   :  { %v2590_v33 = vpop.xlane.xlu0 %2589 }
 0x4d9   :  { %5008 = vrcp.f32 %v2590_v33 }
 0x4da   :  { %5010 = vrcp.f32 %v2596_v29  ;;  %v2593_v51 = vpop.xlane.xlu1 %2592 }
 0x4db   :  { %5012 = vrcp.f32 %v2593_v51 }
 0x4dc   :  { %v2614_v16 = vpop.xlane.xlu0 %2613 }
 0x4dd   :  { %v5007_v42 = vpop.eup %5006 }
 0x4de   :  { %v2655_v32 = vmul.f32 %v5007_v42, %v5950_v27 }
 0x4e0   :  { %v2608_v9 = vpop.xlane.xlu0 %2607 }
 0x4e2   :  { %v2611_v1 = vpop.xlane.xlu1 %2610 }
 0x4e3   :  { %v5009_v53 = vpop.eup %5008  ;;  %5014 = vrcp.f32 %v2611_v1 }
 0x4e4   :  { %v5011_v2 = vpop.eup %5010  ;;  %v2602_v47 = vpop.xlane.xlu0 %2601  ;;  %v2652_v14 = vmul.f32 %v5009_v53, %v5961_v20 }
 0x4e5   :  { %v5013_v63 = vpop.eup %5012  ;;  %v2654_v12 = vmul.f32 %v5011_v2, %v5945_v5  ;;  %5016 = vrcp.f32 %v2602_v47 }
 0x4e6   :  { %v2653_v57 = vmul.f32 %v5013_v63, %v5966_v3  ;;  %5018 = vrcp.f32 %v2608_v9 }
 0x4e7   :  { %v2669_v17 = vpack.c.bf16 %v2655_v32, %v2654_v12 }
 0x4e8   :  { %v2605_v45 = vpop.xlane.xlu1 %2604  ;;  %v2668_v10 = vpack.c.bf16 %v2653_v57, %v2652_v14  ;;  %v2620_v27 = vpop.xlane.xlu0 %2619 }
 0x4e9   :  { %5020 = vrcp.f32 %v2605_v45 }
 0x4ea   :  { %4739 = vmatprep.mubr.msk.bf16.mxu0 %vm2247_vm0, %v2668_v10  ;;  %5022 = vrcp.f32 %v2614_v16 }
 0x4eb   :  { %4740 = vmatmul.mubr.msk.bf16.vlgmr.msra.gmra.mrb[12].mxu0 %vm2247_vm0, %v2669_v17 }
 0x4ec   :  { %4752 = vmatpush3.bf16.msra.mxu0 %v2239_v58  ;;  %v2617_v24 = vpop.xlane.xlu1 %2616 }
 0x4ed   :  { %4753 = vmatprep.subr.bf16.mxu0 %v2240_v6  ;;  %5024 = vrcp.f32 %v2617_v24  ;;  %v5015_v20 = vpop.eup %5014 }
 0x4ee   :  { %5026 = vrcp.f32 %v2620_v27  ;;  %v2659_v15 = vmul.f32 %v5015_v20, %v5985_v49 }
 0x4ef   :  { %v5017_v3 = vpop.eup %5016 }
 0x4f0   :  { %4754 = vmatpush3.bf16.msra.mxu0 %v2240_v6  ;;  %v2623_v5 = vpop.xlane.xlu1 %2622  ;;  %v5019_v19 = vpop.eup %5018  ;;  %v2656_v48 = vmul.f32 %v5017_v3, %v5994_v28 }
 0x4f1   :  { %5028 = vrcp.f32 %v2623_v5  ;;  %v2658_v23 = vmul.f32 %v5019_v19, %v5981_v18 }
 0x4f3   :  { %v5021_v34 = vpop.eup %5020  ;;  %v2671_v7 = vpack.c.bf16 %v2659_v15, %v2658_v23 }
 0x4f4   :  { %v5023_v25 = vpop.eup %5022  ;;  %v2657_v0 = vmul.f32 %v5021_v34, %v6002_v36  ;;  %v2635_v60 = vpop.xlane.xlu1 %2634 }
 0x4f5   :  { %v2660_v50 = vmul.f32 %v5023_v25, %v5975_v56 }
 0x4f6   :  { %v2670_v11 = vpack.c.bf16 %v2657_v0, %v2656_v48 }
 0x4f7   :  { %v5025_v39 = vpop.eup %5024  ;;  %v2626_v55 = vpop.xlane.xlu0 %2625 }
 0x4f8   :  { %v2661_v37 = vmul.f32 %v5025_v39, %v6013_v40  ;;  %v5027_v44 = vpop.eup %5026  ;;  %4747 = vmatprep.mubr.msk.bf16.mxu1 %vm2247_vm0, %v2670_v11  ;;  %5030 = vrcp.f32 %v2626_v55 }
 0x4f9   :  { %4748 = vmatmul.mubr.msk.bf16.vlgmr.msra.gmra.mrb[16].mxu1 %vm2247_vm0, %v2671_v7  ;;  %v2662_v18 = vmul.f32 %v5027_v44, %v5999_v61 }
 0x4fa   :  { %v2672_v49 = vpack.c.bf16 %v2661_v37, %v2660_v50  ;;  %4760 = vmatpush3.bf16.msra.mxu1 %v6135_v62 }
 0x4fb   :  { %v5029_v28 = vpop.eup %5028  ;;  %v2629_v36 = vpop.xlane.xlu0 %2628  ;;  %4761 = vmatprep.subr.bf16.mxu1 %v6137_v52 }
 0x4fc   :  { %v2663_v31 = vmul.f32 %v5029_v28, %v6033_v13  ;;  %5032 = vrcp.f32 %v2629_v36  ;;  %4755 = vmatprep.mubr.msk.bf16.mxu0 %vm2247_vm0, %v2672_v49 }
 0x4fd   :  { %5034 = vrcp.f32 %v2635_v60 }
 0x4fe   :  { %v2673_v56 = vpack.c.bf16 %v2663_v31, %v2662_v18  ;;  %4762 = vmatpush3.bf16.msra.mxu1 %v6137_v52  ;;  %v4878_v52 = vld [vmem:[#allocation10] sm:$0xff]  }
 0x4ff   :  { %v2632_v40 = vpop.xlane.xlu0 %2631  ;;  %4767 = vmatprep.subr.bf16.mxu0 %v4878_v52 }
 0x500   :  { %5036 = vrcp.f32 %v2632_v40  ;;  %4756 = vmatmul.mubr.msk.bf16.vlgmr.msra.gmra.mrb[16].mxu0 %vm2247_vm0, %v2673_v56 }
 0x501   :  { %4768 = vmatpush3.bf16.msra.mxu0 %v4878_v52 }
 0x502   :  { %v5031_v58 = vpop.eup %5030  ;;  %4769 = vmatprep.subr.bf16.mxu0 %v4879_v8 }
 0x503   :  { %v2664_v62 = vmul.f32 %v5031_v58, %v6065_v21  ;;  %v4880_v21 = vld [vmem:[#allocation10 + $0x10] sm:$0xff]  }
 0x505   :  { %4770 = vmatpush3.bf16.msra.mxu0 %v4879_v8 }
 0x506   :  { %v5033_v35 = vpop.eup %5032  ;;  %4771 = vmatprep.subr.bf16.mxu0 %v4880_v21 }
 0x507   :  { %v2665_v61 = vmul.f32 %v5033_v35, %v6079_v4  ;;  %v5035_v13 = vpop.eup %5034  ;;  %v4881_v4 = vld [vmem:[#allocation10 + $0x18] sm:$0xff]  }
 0x508   :  { %v2667_v26 = vmul.f32 %v5035_v13, %v6055_v43 }
 0x509   :  { %v2674_v54 = vpack.c.bf16 %v2665_v61, %v2664_v62  ;;  %4772 = vmatpush3.bf16.msra.mxu0 %v4880_v21 }
 0x50a   :  { %v5037_v22 = vpop.eup %5036  ;;  %4773 = vmatprep.subr.bf16.mxu0 %v4881_v4 }
 0x50b   :  { %v2666_v6 = vmul.f32 %v5037_v22, %v6047_v38  ;;  %4763 = vmatprep.mubr.msk.bf16.mxu1 %vm2247_vm0, %v2674_v54 }
 0x50d   :  { %v2675_v29 = vpack.c.bf16 %v2667_v26, %v2666_v6  ;;  %4774 = vmatpush3.bf16.msra.mxu0 %v4881_v4 }
 0x50f   :  { %4764 = vmatmul.mubr.msk.bf16.vlgmr.msra.gmra.mrb[20].mxu1 %vm2247_vm0, %v2675_v29 }
 0x510   :  { %3941 = vmatprep.mubr.bf16.mxu1 %v5251_v30 }
 0x5be   :  { %v4741_v38 = vpop.f32.mrb[12].mxu0 }
 0x5bf   :  { %v2716_v43 = vpop.f32.mrb[13].mxu0 }
 0x5c0   :  { %v4742_v33 = vpop.f32.mrb[14].mxu0 }
 0x5c1   :  { %v2719_v51 = vpop.f32.mrb[15].mxu0 }
 0x5cc   :  { %v4749_v16 = vpop.f32.mrb[16].mxu1 }
 0x5cd   :  { %v2771_v9 = vpop.f32.mrb[17].mxu1 }
 0x5ce   :  { %v6168_v42 = vpop.f32.mrb[18].mxu1 }
 0x5cf   :  { %v6170_v53 = vpop.f32.mrb[19].mxu1 }
 0x5d3   :  { %v4757_v2 = vpop.f32.mrb[16].mxu0 }
 0x5d4   :  { %v3032_v1 = vcombine.low %v4741_v38, %v4757_v2  ;;  %v3033_v63 = vcombine.high %v4741_v38, %v4757_v2  ;;  %v2826_v32 = vpop.f32.mrb[17].mxu0 }
 0x5d5   :  { %v2896_v47 = vcombine.low %v2716_v43, %v2826_v32  ;;  %v2897_v14 = vcombine.high %v2716_v43, %v2826_v32  ;;  %v4758_v57 = vpop.f32.mrb[18].mxu0 }
 0x5d6   :  { %v3100_v12 = vcombine.low %v4742_v33, %v4758_v57  ;;  %v3101_v45 = vcombine.high %v4742_v33, %v4758_v57  ;;  %v2829_v10 = vpop.f32.mrb[19].mxu0  ;;  %v3040_v24 = vrot.slane %v3032_v1, %v5521_v46  ;;  %v3047_v5 = vrot.slane %v3033_v63, %v5521_v46 }
 0x5d7   :  { %v2964_v17 = vcombine.low %v2719_v51, %v2829_v10  ;;  %v2965_v27 = vcombine.high %v2719_v51, %v2829_v10  ;;  %v2904_v20 = vrot.slane %v2896_v47, %v5521_v46  ;;  %v2911_v3 = vrot.slane %v2897_v14, %v5521_v46 }
 0x5d8   :  { %v6177_v34 = vrot.slane %v3100_v12, %v5521_v46  ;;  %v6180_v15 = vrot.slane %v3101_v45, %v5521_v46 }
 0x5d9   :  { %v6183_v23 = vrot.slane %v2964_v17, %v5521_v46  ;;  %v6186_v39 = vrot.slane %v2965_v27, %v5521_v46 }
 0x5e2   :  { %v4765_v19 = vpop.f32.mrb[20].mxu1 }
 0x5e3   :  { %v3048_v25 = vcombine.low %v4749_v16, %v4765_v19  ;;  %v3049_v48 = vcombine.high %v4749_v16, %v4765_v19  ;;  %v2881_v0 = vpop.f32.mrb[21].mxu1 }
 0x5e4   :  { %v2912_v55 = vcombine.low %v2771_v9, %v2881_v0  ;;  %v2913_v11 = vcombine.high %v2771_v9, %v2881_v0  ;;  %v4766_v7 = vpop.f32.mrb[22].mxu1 }
 0x5e5   :  { %v3056_v50 = vrot.slane %v3048_v25, %v5521_v46  ;;  %v3063_v37 = vrot.slane %v3049_v48, %v5521_v46  ;;  %v3116_v44 = vcombine.low %v6168_v42, %v4766_v7  ;;  %v3117_v49 = vcombine.high %v6168_v42, %v4766_v7  ;;  %v2884_v28 = vpop.f32.mrb[23].mxu1 }
 0x5e6   :  { %v2920_v60 = vrot.slane %v2912_v55, %v5521_v46  ;;  %v2927_v36 = vrot.slane %v2913_v11, %v5521_v46  ;;  %v2980_v18 = vcombine.low %v6170_v53, %v2884_v28  ;;  %v2981_v31 = vcombine.high %v6170_v53, %v2884_v28 }
 0x5e7   :  { %v3064_v56 = vcombine.low %v3040_v24, %v3056_v50  ;;  %v3065_v40 = vcombine.high %v3040_v24, %v3056_v50  ;;  %v3080_v58 = vcombine.low %v3047_v5, %v3063_v37  ;;  %v3081_v35 = vcombine.high %v3047_v5, %v3063_v37 }
 0x5e8   :  { %v2928_v62 = vcombine.low %v2904_v20, %v2920_v60  ;;  %v2929_v61 = vcombine.high %v2904_v20, %v2920_v60  ;;  %v2944_v13 = vcombine.low %v2911_v3, %v2927_v36  ;;  %v2945_v54 = vcombine.high %v2911_v3, %v2927_v36 }
 0x5e9   :  { %v3072_v22 = vrot.slane %v3064_v56, %v5529_v59  ;;  %v3079_v26 = vrot.slane %v3065_v40, %v5529_v59  ;;  %v3088_v6 = vrot.slane %v3080_v58, %v5529_v59  ;;  %v3095_v29 = vrot.slane %v3081_v35, %v5529_v59 }
 0x5ea   :  { %v2936_v52 = vrot.slane %v2928_v62, %v5529_v59  ;;  %v2943_v8 = vrot.slane %v2929_v61, %v5529_v59  ;;  %v2952_v21 = vrot.slane %v2944_v13, %v5529_v59  ;;  %v2959_v4 = vrot.slane %v2945_v54, %v5529_v59 }
 0x5eb   :  { %v3304_v38 = vcombine.low %v3072_v22, %v3079_v26  ;;  %v4495_v43 = vcombine.high %v3072_v22, %v3079_v26  ;;  %v3320_v33 = vcombine.low %v3088_v6, %v3095_v29  ;;  %v4496_v51 = vcombine.high %v3088_v6, %v3095_v29  ;;  %v4882_v22 = vld [vmem:[#allocation10 + $0x20] sm:$0xff]  }
 0x5ec   :  { %v3168_v16 = vcombine.low %v2936_v52, %v2943_v8  ;;  %v4491_v9 = vcombine.high %v2936_v52, %v2943_v8  ;;  %v3184_v42 = vcombine.low %v2952_v21, %v2959_v4  ;;  %v4492_v53 = vcombine.high %v2952_v21, %v2959_v4  ;;  %4775 = vmatprep.subr.bf16.mxu0 %v4882_v22 }
 0x5ed   :  { %v6205_v2 = vrot.slane %v3304_v38, %v5521_v46  ;;  %v6208_v1 = vrot.slane %v4495_v43, %v5521_v46  ;;  %v6211_v63 = vrot.slane %v3320_v33, %v5521_v46  ;;  %v6214_v32 = vrot.slane %v4496_v51, %v5521_v46  ;;  %4776 = vmatpush3.bf16.msra.mxu0 %v4882_v22 }
 0x5ee   :  { %v6217_v47 = vrot.slane %v3168_v16, %v5521_v46  ;;  %v6220_v14 = vrot.slane %v4491_v9, %v5521_v46  ;;  %v6223_v57 = vrot.slane %v3184_v42, %v5521_v46  ;;  %v6226_v12 = vrot.slane %v4492_v53, %v5521_v46 }
 0x5ef   :  { %v3124_v45 = vrot.slane %v3116_v44, %v5521_v46  ;;  %v3131_v10 = vrot.slane %v3117_v49, %v5521_v46  ;;  %v2988_v17 = vrot.slane %v2980_v18, %v5521_v46  ;;  %v2995_v27 = vrot.slane %v2981_v31, %v5521_v46 }
 0x5f0   :  { %v3336_v24 = vcombine.low %v6205_v2, %v6208_v1  ;;  %v3352_v5 = vcombine.low %v6211_v63, %v6214_v32  ;;  %v3200_v20 = vcombine.low %v6217_v47, %v6220_v14  ;;  %v3216_v3 = vcombine.low %v6223_v57, %v6226_v12 }
 0x5f1   :  { %v3132_v19 = vcombine.low %v6177_v34, %v3124_v45  ;;  %v3133_v25 = vcombine.high %v6177_v34, %v3124_v45  ;;  %v3148_v48 = vcombine.low %v6180_v15, %v3131_v10  ;;  %v3149_v0 = vcombine.high %v6180_v15, %v3131_v10 }
 0x5f2   :  { %v2996_v55 = vcombine.low %v6183_v23, %v2988_v17  ;;  %v2997_v11 = vcombine.high %v6183_v23, %v2988_v17  ;;  %v3012_v7 = vcombine.low %v6186_v39, %v2995_v27  ;;  %v3013_v50 = vcombine.high %v6186_v39, %v2995_v27 }
 0x5f3   :  { %v3140_v37 = vrot.slane %v3132_v19, %v5529_v59  ;;  %v3147_v44 = vrot.slane %v3133_v25, %v5529_v59  ;;  %v3156_v49 = vrot.slane %v3148_v48, %v5529_v59  ;;  %v3163_v34 = vrot.slane %v3149_v0, %v5529_v59 }
 0x5f4   :  { %v3004_v28 = vrot.slane %v2996_v55, %v5529_v59  ;;  %v3011_v15 = vrot.slane %v2997_v11, %v5529_v59  ;;  %v3020_v60 = vrot.slane %v3012_v7, %v5529_v59  ;;  %v3027_v23 = vrot.slane %v3013_v50, %v5529_v59 }
 0x5f5   :  { %v3372_v36 = vcombine.low %v3140_v37, %v3147_v44  ;;  %v4497_v18 = vcombine.high %v3140_v37, %v3147_v44  ;;  %v3388_v31 = vcombine.low %v3156_v49, %v3163_v34  ;;  %v4498_v39 = vcombine.high %v3156_v49, %v3163_v34 }
 0x5f6   :  { %v3236_v56 = vcombine.low %v3004_v28, %v3011_v15  ;;  %v4493_v40 = vcombine.high %v3004_v28, %v3011_v15  ;;  %v3252_v58 = vcombine.low %v3020_v60, %v3027_v23  ;;  %v4494_v35 = vcombine.high %v3020_v60, %v3027_v23 }
 0x5f7   :  { %v3379_v62 = vrot.slane %v3372_v36, %v5521_v46  ;;  %v3387_v61 = vrot.slane %v4497_v18, %v5521_v46  ;;  %v3395_v13 = vrot.slane %v3388_v31, %v5521_v46  ;;  %v3403_v54 = vrot.slane %v4498_v39, %v5521_v46 }
 0x5f8   :  { %v3243_v26 = vrot.slane %v3236_v56, %v5521_v46  ;;  %v3251_v6 = vrot.slane %v4493_v40, %v5521_v46  ;;  %v3259_v29 = vrot.slane %v3252_v58, %v5521_v46  ;;  %v3267_v52 = vrot.slane %v4494_v35, %v5521_v46  ;;  %v4885_v56 = vld [vmem:[#allocation10 + $0x38] sm:$0xff]  }
 0x5f9   :  { %v6265_v8 = vrot.slane %v3336_v24, %v5529_v59  ;;  %v6268_v21 = vrot.slane %v3352_v5, %v5529_v59  ;;  %v3404_v4 = vcombine.low %v3379_v62, %v3387_v61  ;;  %v3420_v38 = vcombine.low %v3395_v13, %v3403_v54  ;;  %v4883_v24 = vld [vmem:[#allocation10 + $0x28] sm:$0xff]  }
 0x5fa   :  { %v6271_v43 = vrot.slane %v3200_v20, %v5529_v59  ;;  %v6274_v33 = vrot.slane %v3216_v3, %v5529_v59  ;;  %v3268_v51 = vcombine.low %v3243_v26, %v3251_v6  ;;  %v3284_v16 = vcombine.low %v3259_v29, %v3267_v52  ;;  %4777 = vmatprep.subr.bf16.mxu0 %v4883_v24 }
 0x5fb   :  { %v3368_v46 = vcombine.low %v6265_v8, %v6268_v21  ;;  %v3369_v9 = vcombine.high %v6265_v8, %v6268_v21  ;;  %v6281_v42 = vrot.slane %v3404_v4, %v5529_v59  ;;  %v6284_v53 = vrot.slane %v3420_v38, %v5529_v59  ;;  %4778 = vmatpush3.bf16.msra.mxu0 %v4883_v24 }
 0x5fc   :  { %v3232_v45 = vcombine.low %v6271_v43, %v6274_v33  ;;  %v3233_v10 = vcombine.high %v6271_v43, %v6274_v33  ;;  %v6291_v17 = vrot.slane %v3268_v51, %v5529_v59  ;;  %v6294_v27 = vrot.slane %v3284_v16, %v5529_v59 }
 0x5fd   :  { %v3437_v5 = vcombine.high %v6281_v42, %v6284_v53  ;;  %v3436_v20 = vcombine.low %v6281_v42, %v6284_v53  ;;  %v3337_v3 = vcombine.high %v6205_v2, %v6208_v1  ;;  %v3353_v19 = vcombine.high %v6211_v63, %v6214_v32  ;;  %v4884_v1 = vld [vmem:[#allocation10 + $0x30] sm:$0xff]  }
 0x5fe   :  { %v3301_v25 = vcombine.high %v6291_v17, %v6294_v27  ;;  %v3300_v48 = vcombine.low %v6291_v17, %v6294_v27  ;;  %v3405_v0 = vcombine.high %v3379_v62, %v3387_v61  ;;  %v3421_v55 = vcombine.high %v3395_v13, %v3403_v54  ;;  %4779 = vmatprep.subr.bf16.mxu0 %v4884_v1 }
 0x5ff   :  { %v4816_v11 = vpack.i.bf16 %v3437_v5, %v3369_v9  ;;  %v3351_v7 = vrot.slane %v3337_v3, %v5529_v59  ;;  %v3367_v50 = vrot.slane %v3353_v19, %v5529_v59  ;;  %v3201_v2 = vcombine.high %v6217_v47, %v6220_v14  ;;  %4780 = vmatpush3.bf16.msra.mxu0 %v4884_v1  ;;  %v5046_v1 = vld [vmem:[#allocation2] sm:$0xff] }
 0x600   :  { %v4826_v63 = vpack.i.bf16 %v3301_v25, %v3233_v10  ;;  %v3419_v32 = vrot.slane %v3405_v0, %v5529_v59  ;;  %v3435_v37 = vrot.slane %v3421_v55, %v5529_v59  ;;  %v3217_v44 = vcombine.high %v6223_v57, %v6226_v12  ;;  %4781 = vmatprep.subr.bf16.mxu0 %v4885_v56 }
 0x601   :  { %4817 = vrot.lane.b32.xlu1 %v4816_v11, %s5253_s21  ;;  %v3370_v49 = vcombine.low %v3351_v7, %v3367_v50  ;;  %v3215_v34 = vrot.slane %v3201_v2, %v5529_v59  ;;  %v3269_v28 = vcombine.high %v3243_v26, %v3251_v6  ;;  %v3285_v15 = vcombine.high %v3259_v29, %v3267_v52 }
 0x602   :  { %4827 = vrot.lane.b32.xlu0 %v4826_v63, %s5253_s21  ;;  %v3438_v47 = vcombine.low %v3419_v32, %v3435_v37  ;;  %v3231_v14 = vrot.slane %v3217_v44, %v5529_v59  ;;  %v3371_v60 = vcombine.high %v3351_v7, %v3367_v50  ;;  %v3439_v23 = vcombine.high %v3419_v32, %v3435_v37  ;;  %v4499_v7 = vld [vmem:[#allocation5 + $0x2] ss:$0 sm:$0xff]  ;;  %v5047_v44 = vld [vmem:[#allocation2 + $0x8] sm:$0xff] }
 0x603   :  { %v3283_v36 = vrot.slane %v3269_v28, %v5529_v59  ;;  %v3299_v18 = vrot.slane %v3285_v15, %v5529_v59  ;;  %4782 = vmatpush3.bf16.msra.mxu0 %v4885_v56  ;;  %v5048_v28 = vld [vmem:[#allocation2 + $0x18] sm:$0xff] }
 0x604   :  { %v4821_v57 = vpack.i.bf16 %v3438_v47, %v3370_v49  ;;  %v3235_v12 = vcombine.high %v3215_v34, %v3231_v14  ;;  %v3234_v31 = vcombine.low %v3215_v34, %v3231_v14  ;;  %v4841_v39 = vpack.i.bf16 %v3439_v23, %v3371_v60  ;;  %v5049_v23 = vld [vmem:[#allocation2 + $0x10] sm:$0xff]  ;;  %v4892_v56 = vld [vmem:[#allocation11 + $0x20] ss:$16 sps:$4 sm:$0xff]  }
 0x605   :  { %v3303_v40 = vcombine.high %v3283_v36, %v3299_v18  ;;  %v3302_v58 = vcombine.low %v3283_v36, %v3299_v18 }
 0x606   :  { %4822 = vrot.lane.b32.xlu1 %v4821_v57, %s5248_s2  ;;  %v4886_v57 = vld [vmem:[#allocation11] ss:$16 sps:$4 sm:$0xff]  }
 0x607   :  { %v4836_v35 = vpack.i.bf16 %v3303_v40, %v3235_v12  ;;  %v4831_v62 = vpack.i.bf16 %v3302_v58, %v3234_v31  ;;  %v4888_v12 = vld [vmem:[#allocation11 + $0x4] ss:$16 sps:$4 sm:$0xff]   ;;  %v4889_v31 = vld [vmem:[#allocation11 + $0x8] ss:$16 sps:$4 sm:$0xff]  }
 0x608   :  { %3909 = vmatprep.subr.bf16.mxu1 %v4888_v12  ;;  %v4894_v40 = vld [vmem:[#allocation11 + $0x24] ss:$16 sps:$4 sm:$0xff]   ;;  %v4895_v58 = vld [vmem:[#allocation11 + $0x28] ss:$16 sps:$4 sm:$0xff]  }
 0x609   :  { %4837 = vrot.lane.b32.xlu0 %v4836_v35, %s5252_s7  ;;  %3910 = vmatpush1.bf16.msra.mxu1 %v4886_v57  ;;  %v4897_v35 = vld [vmem:[#allocation11 + $0x2c] ss:$16 sps:$4 sm:$0xff]  }
 0x60a   :  { %4832 = vrot.lane.b32.xlu1 %v4831_v62, %s5248_s2  ;;  %3911 = vmatprep.subr.bf16.mxu1 %v4894_v40  ;;  %v4898_v62 = vld [vmem:[#allocation11 + $0x40] ss:$16 sps:$4 sm:$0xff]  }
 0x60d   :  { %3912 = vmatpush1.bf16.msra.mxu1 %v4892_v56 }
 0x60e   :  { %4842 = vrot.lane.b32.xlu1 %v4841_v39, %s5252_s7  ;;  %v4891_v39 = vld [vmem:[#allocation11 + $0xc] ss:$16 sps:$4 sm:$0xff]  }
 0x60f   :  { %3962 = vmatprep.subr.bf16.mxu0 %v4891_v39 }
 0x673   :  { %v4818_v59 = vpop.permute.xlu1 %4817 }
 0x674   :  { %v4828_v61 = vpop.permute.xlu0 %4827  ;;  %v4820_v6 = vunpack.i.h.bf16 %v4818_v59  ;;  %v4819_v29 = vunpack.i.l.bf16 %v4818_v59  ;;  %v4900_v59 = vld [vmem:[#allocation11 + $0x44] ss:$16 sps:$4 sm:$0xff]  }
 0x675   :  { %v4830_v54 = vunpack.i.h.bf16 %v4828_v61  ;;  %v4829_v22 = vunpack.i.l.bf16 %v4828_v61  ;;  %v4901_v61 = vld [vmem:[#allocation11 + $0x48] ss:$16 sps:$4 sm:$0xff]   ;;  %3913 = vmatprep.subr.bf16.mxu1 %v4900_v59 }
 0x676   :  { %v3490_v3 = vsel %vm2247_vm0, %v3368_v46, %v4819_v29  ;;  %v3491_v19 = vsel %vm2247_vm0, %v3436_v20, %v4820_v6  ;;  %3914 = vmatpush1.bf16.msra.mxu1 %v4898_v62  ;;  %v4907_v6 = vld [vmem:[#allocation11 + $0x68] ss:$16 sps:$4 sm:$0xff]   ;;  %v4910_v29 = vld [vmem:[#allocation11 + $0x80] ss:$16 sps:$4 sm:$0xff]  }
 0x677   :  { %v3488_v4 = vsel %vm2247_vm0, %v3232_v45, %v4829_v22  ;;  %v3489_v38 = vsel %vm2247_vm0, %v3300_v48, %v4830_v54  ;;  %v4906_v54 = vld [vmem:[#allocation11 + $0x64] ss:$16 sps:$4 sm:$0xff]   ;;  %v4904_v22 = vld [vmem:[#allocation11 + $0x60] ss:$16 sps:$4 sm:$0xff]  }
 0x678   :  { %v4823_v13 = vpop.permute.xlu1 %4822  ;;  %3915 = vmatprep.subr.bf16.mxu1 %v4906_v54 }
 0x679   :  { %v4825_v9 = vunpack.i.h.bf16 %v4823_v13  ;;  %v4824_v10 = vunpack.i.l.bf16 %v4823_v13  ;;  %v4903_v13 = vld [vmem:[#allocation11 + $0x4c] ss:$16 sps:$4 sm:$0xff]  }
 0x67a   :  { %3916 = vmatpush1.bf16.msra.mxu1 %v4904_v22  ;;  %v4509_v22 = vld [vmem:[#allocation5 + $0x4] ss:$0 sm:$0xff] }
 0x67b   :  { %v4838_v26 = vpop.permute.xlu0 %4837  ;;  %v3495_v55 = vsel %vm3492_vm1, %v3490_v3, %v4824_v10  ;;  %v3496_v11 = vsel %vm3492_vm1, %v3491_v19, %v4825_v9  ;;  %v4916_v9 = vld [vmem:[#allocation11 + $0xa0] ss:$16 sps:$4 sm:$0xff]   ;;  %v4919_v10 = vld [vmem:[#allocation11 + $0xa8] ss:$16 sps:$4 sm:$0xff]   ;;  %v4930_v3 = vld [vmem:[#allocation11 + $0xe4] ss:$16 sps:$4 sm:$0xff]  }
 0x67c   :  { %v4833_v52 = vpop.permute.xlu1 %4832  ;;  %v4840_v17 = vunpack.i.h.bf16 %v4838_v26  ;;  %v4839_v27 = vunpack.i.l.bf16 %v4838_v26  ;;  %v4909_v26 = vld [vmem:[#allocation11 + $0x6c] ss:$16 sps:$4 sm:$0xff]   ;;  %v4934_v19 = vld [vmem:[#allocation13 + $0x40] sm:$0xff]  }
 0x67d   :  { %v4835_v51 = vunpack.i.h.bf16 %v4833_v52  ;;  %v4834_v16 = vunpack.i.l.bf16 %v4833_v52  ;;  %v4912_v52 = vld [vmem:[#allocation11 + $0x84] ss:$16 sps:$4 sm:$0xff]  }
 0x67e   :  { %3917 = vmatprep.subr.bf16.mxu1 %v4912_v52 }
 0x67f   :  { %v3493_v24 = vsel %vm3492_vm1, %v3488_v4, %v4834_v16  ;;  %v3494_v5 = vsel %vm3492_vm1, %v3489_v38, %v4835_v51  ;;  %v4913_v4 = vld [vmem:[#allocation11 + $0x88] ss:$16 sps:$4 sm:$0xff]   ;;  %v4915_v38 = vld [vmem:[#allocation11 + $0x8c] ss:$16 sps:$4 sm:$0xff]   ;;  %v4918_v51 = vld [vmem:[#allocation11 + $0xa4] ss:$16 sps:$4 sm:$0xff]   ;;  %3918 = vmatpush1.bf16.msra.mxu1 %v4910_v29 }
 0x680   :  { %v4843_v43 = vpop.permute.xlu1 %4842  ;;  %v3498_v33 = vsel %vm3497_vm2, %v3493_v24, %v4839_v27  ;;  %v3499_v45 = vsel %vm3497_vm2, %v3494_v5, %v4840_v17  ;;  %v4921_v16 = vld [vmem:[#allocation11 + $0xac] ss:$16 sps:$4 sm:$0xff]   ;;  %3919 = vmatprep.subr.bf16.mxu1 %v4918_v51  ;;  %v4924_v17 = vld [vmem:[#allocation11 + $0xc4] ss:$16 sps:$4 sm:$0xff]   ;;  %v4922_v24 = vld [vmem:[#allocation11 + $0xc0] ss:$16 sps:$4 sm:$0xff]  }
 0x681   :  { %v4845_v25 = vunpack.i.h.bf16 %v4843_v43  ;;  %v4844_v48 = vunpack.i.l.bf16 %v4843_v43  ;;  %v3502_v0 = vpack.c.bf16 %v3499_v45, %v3498_v33  ;;  %v4927_v27 = vld [vmem:[#allocation11 + $0xcc] ss:$16 sps:$4 sm:$0xff]   ;;  %v4925_v5 = vld [vmem:[#allocation11 + $0xc8] ss:$16 sps:$4 sm:$0xff]   ;;  %v4928_v33 = vld [vmem:[#allocation11 + $0xe0] ss:$16 sps:$4 sm:$0xff]  }
 0x682   :  { %v4933_v43 = vld [vmem:[#allocation11 + $0xec] ss:$16 sps:$4 sm:$0xff]   ;;  %v4931_v45 = vld [vmem:[#allocation11 + $0xe8] ss:$16 sps:$4 sm:$0xff]  }
 0x683   :  { %v3501_v8 = vsel %vm3497_vm2, %v3496_v11, %v4845_v25  ;;  %v3500_v21 = vsel %vm3497_vm2, %v3495_v55, %v4844_v48  ;;  %4783 = vmatprep.mubr.bf16.mxu0 %v3502_v0  ;;  %3920 = vmatpush1.bf16.msra.mxu1 %v4916_v9  ;;  %v4935_v25 = vld [vmem:[#allocation13 + $0xc0] sm:$0xff]  }
 0x684   :  { %v3503_v46 = vpack.c.bf16 %v3501_v8, %v3500_v21  ;;  %3921 = vmatprep.subr.bf16.mxu1 %v4924_v17  ;;  %v4937_v9 = vld [vmem:[#allocation13 + $0x80] sm:$0xff]   ;;  %v4938_v17 = vld [vmem:[#allocation13 + $0x48] sm:$0xff]  }
 0x686   :  { %4784 = vmatmul.mubr.bf16.vlgmr.msra.gmra.mrb[20].mxu0 %v3503_v46 }
 0x687   :  { %3994 = vmatprep.mubr.bf16.mxu0 %v5251_v30  ;;  %3963 = vmatpush1.bf16.msra.mxu0 %v4889_v31 }
 0x688   :  { %3964 = vmatprep.subr.bf16.mxu0 %v4897_v35  ;;  %3922 = vmatpush1.bf16.msra.mxu1 %v4922_v24  ;;  %v4508_v35 = vld [vmem:[#allocation5 + $0x3] ss:$0 sm:$0xff] }
 0x689   :  { %3923 = vmatprep.subr.bf16.mxu1 %v4930_v3 }
 0x68b   :  { %3965 = vmatpush1.bf16.msra.mxu0 %v4895_v58 }
 0x68c   :  { %3966 = vmatprep.subr.bf16.mxu0 %v4903_v13  ;;  %3924 = vmatpush1.bf16.msra.mxu1 %v4928_v33  ;;  %v4941_v33 = vld [vmem:[#allocation13 + $0x88] sm:$0xff]  }
 0x68d   :  { %4627 = vmatprep.subr.bf16.mxu1 %v4934_v19  ;;  %v4943_v19 = vld [vmem:[#allocation13 + $0xd0] sm:$0xff]  }
 0x68f   :  { %3967 = vmatpush1.bf16.msra.mxu0 %v4901_v61 }
 0x690   :  { %3968 = vmatprep.subr.bf16.mxu0 %v4909_v26 }
 0x693   :  { %3969 = vmatpush1.bf16.msra.mxu0 %v4907_v6 }
 0x694   :  { %3970 = vmatprep.subr.bf16.mxu0 %v4915_v38 }
 0x697   :  { %3971 = vmatpush1.bf16.msra.mxu0 %v4913_v4 }
 0x698   :  { %3972 = vmatprep.subr.bf16.mxu0 %v4921_v16  ;;  %v4936_v16 = vld [vmem:[#allocation13] sm:$0xff]  }
 0x69b   :  { %3973 = vmatpush1.bf16.msra.mxu0 %v4919_v10 }
 0x69c   :  { %3974 = vmatprep.subr.bf16.mxu0 %v4927_v27  ;;  %v4939_v27 = vld [vmem:[#allocation13 + $0xc8] sm:$0xff]  }
 0x69f   :  { %3975 = vmatpush1.bf16.msra.mxu0 %v4925_v5 }
 0x6a0   :  { %3976 = vmatprep.subr.bf16.mxu0 %v4933_v43  ;;  %v4940_v43 = vld [vmem:[#allocation13 + $0x8] sm:$0xff]  }
 0x6a3   :  { %3977 = vmatpush1.bf16.msra.mxu0 %v4931_v45  ;;  %v4942_v45 = vld [vmem:[#allocation13 + $0x50] sm:$0xff]  }
 0x6a4   :  { %4655 = vmatprep.subr.bf16.mxu0 %v4935_v25 }
 0x759   :  { %v4785_v42 = vpop.f32.mrb[20].mxu0 }
 0x75a   :  { %v3606_v53 = vpop.f32.mrb[21].mxu0  ;;  %v3615_v47 = vadd.f32 %v4785_v42, %v4499_v7 }
 0x75b   :  { %v3607_v20 = vadd.f32 %v4499_v7, %v3606_v53  ;;  %v4786_v50 = vpop.f32.mrb[22].mxu0 }
 0x75c   :  { %v3609_v2 = vpop.f32.mrb[23].mxu0  ;;  %v3618_v37 = vadd.f32 %v4786_v50, %v4499_v7  ;;  %v6363_v36 = vadd.f32 %v5049_v23, %v3615_v47 }
 0x75d   :  { %v6348_v63 = vadd.f32 %v5046_v1, %v3607_v20  ;;  %v3610_v32 = vadd.f32 %v4499_v7, %v3609_v2 }
 0x75e   :  { %v6356_v15 = vadd.f32 %v5048_v28, %v3618_v37  ;;  %v3639_v18 = vmul.f32 %v6363_v36, %v6363_v36 }
 0x75f   :  { %v6350_v49 = vadd.f32 %v5047_v44, %v3610_v32  ;;  %3625 = vadd.xlane.f32.xlu0 %v6348_v63  ;;  %v3637_v34 = vmul.f32 %v6348_v63, %v6348_v63 }
 0x760   :  { %v3640_v60 = vmul.f32 %v6356_v15, %v6356_v15 }
 0x761   :  { %3627 = vadd.xlane.f32.xlu1 %v6350_v49  ;;  %v3638_v14 = vmul.f32 %v6350_v49, %v6350_v49 }
 0x763   :  { %3641 = vadd.xlane.f32.xlu0 %v3637_v34 }
 0x765   :  { %3631 = vadd.xlane.f32.xlu1 %v6356_v15 }
 0x767   :  { %3643 = vadd.xlane.f32.xlu0 %v3638_v14 }
 0x769   :  { %3647 = vadd.xlane.f32.xlu1 %v3640_v60 }
 0x76b   :  { %3629 = vadd.xlane.f32.xlu0 %v6363_v36 }
 0x76f   :  { %3645 = vadd.xlane.f32.xlu0 %v3639_v18 }
 0x7ec   :  { %v3626_v48 = vpop.xlane.xlu0 %3625 }
 0x7ed   :  { %v3633_v0 = vmul.f32 0.0078125, %v3626_v48 }
 0x7ee   :  { %v3628_v55 = vpop.xlane.xlu1 %3627 }
 0x7ef   :  { %v3653_v8 = vmul.f32 %v3633_v0, %v3633_v0  ;;  %v3634_v21 = vmul.f32 0.0078125, %v3628_v55  ;;  %v3661_v39 = vsub.f32 %v6348_v63, %v3633_v0  ;;  %v4944_v55 = vld [vmem:[#allocation13 + $0x10] sm:$0xff]  }
 0x7f0   :  { %v3642_v11 = vpop.xlane.xlu0 %3641 }
 0x7f1   :  { %v3649_v46 = vmul.f32 0.0078125, %v3642_v11  ;;  %v3654_v50 = vmul.f32 %v3634_v21, %v3634_v21  ;;  %v3662_v62 = vsub.f32 %v6350_v49, %v3634_v21  ;;  %v4945_v11 = vld [vmem:[#allocation13 + $0x90] sm:$0xff]   ;;  %v4948_v21 = vld [vmem:[#allocation13 + $0x18] sm:$0xff]  }
 0x7f2   :  { %v3632_v7 = vpop.xlane.xlu1 %3631 }
 0x7f3   :  { %v3657_v42 = vsub.f32 %v3649_v46, %v3653_v8  ;;  %v3636_v53 = vmul.f32 0.0078125, %v3632_v7  ;;  %v4946_v8 = vld [vmem:[#allocation13 + $0x58] sm:$0xff]   ;;  %v4950_v7 = vld [vmem:[#allocation13 + $0x60] sm:$0xff]  }
 0x7f4   :  { %v3644_v20 = vpop.xlane.xlu0 %3643  ;;  %v4949_v46 = vld [vmem:[#allocation13 + $0x98] sm:$0xff]  }
 0x7f5   :  { %v3665_v2 = vadd.f32 1e-05, %v3657_v42  ;;  %v3650_v1 = vmul.f32 0.0078125, %v3644_v20  ;;  %v3656_v37 = vmul.f32 %v3636_v53, %v3636_v53  ;;  %v3664_v26 = vsub.f32 %v6356_v15, %v3636_v53  ;;  %v4951_v42 = vld [vmem:[#allocation13 + $0xe0] sm:$0xff]  }
 0x7f6   :  { %v3648_v32 = vpop.xlane.xlu1 %3647  ;;  %v4952_v53 = vld [vmem:[#allocation13 + $0x20] sm:$0xff]  }
 0x7f7   :  { %5038 = vrsqrt.f32 %v3665_v2  ;;  %v3658_v44 = vsub.f32 %v3650_v1, %v3654_v50  ;;  %v3652_v34 = vmul.f32 0.0078125, %v3648_v32  ;;  %v4953_v20 = vld [vmem:[#allocation13 + $0xa0] sm:$0xff]   ;;  %v4954_v50 = vld [vmem:[#allocation13 + $0x68] sm:$0xff]  }
 0x7f8   :  { %v3630_v28 = vpop.xlane.xlu0 %3629  ;;  %v4955_v2 = vld [vmem:[#allocation13 + $0xe8] sm:$0xff]  }
 0x7f9   :  { %v3666_v47 = vadd.f32 1e-05, %v3658_v44  ;;  %v3660_v14 = vsub.f32 %v3652_v34, %v3656_v37  ;;  %v3635_v60 = vmul.f32 0.0078125, %v3630_v28  ;;  %v4956_v1 = vld [vmem:[#allocation13 + $0x28] sm:$0xff]   ;;  %v4958_v37 = vld [vmem:[#allocation13 + $0x70] sm:$0xff]  }
 0x7fa   :  { %v4957_v32 = vld [vmem:[#allocation13 + $0xa8] sm:$0xff]   ;;  %v4959_v44 = vld [vmem:[#allocation13 + $0xf0] sm:$0xff]  }
 0x7fb   :  { %5040 = vrsqrt.f32 %v3666_v47  ;;  %v3668_v23 = vadd.f32 1e-05, %v3660_v14  ;;  %v3655_v57 = vmul.f32 %v3635_v60, %v3635_v60  ;;  %v3663_v38 = vsub.f32 %v6363_v36, %v3635_v60  ;;  %v4960_v34 = vld [vmem:[#allocation13 + $0x30] sm:$0xff]   ;;  %v4962_v47 = vld [vmem:[#allocation13 + $0x78] sm:$0xff]  }
 0x7fc   :  { %v3646_v18 = vpop.xlane.xlu0 %3645  ;;  %v4961_v28 = vld [vmem:[#allocation13 + $0xb0] sm:$0xff]   ;;  %v4963_v14 = vld [vmem:[#allocation13 + $0xf8] sm:$0xff]  }
 0x7fd   :  { %5042 = vrsqrt.f32 %v3668_v23  ;;  %v3651_v12 = vmul.f32 0.0078125, %v3646_v18  ;;  %v4964_v60 = vld [vmem:[#allocation13 + $0x38] sm:$0xff]   ;;  %v3731_v18 = vsub.s32 0, %v5518_v41 }
 0x7fe   :  { %v4965_v23 = vld [vmem:[#allocation13 + $0xb8] sm:$0xff]  }
 0x7ff   :  { %v3659_v31 = vsub.f32 %v3651_v12, %v3655_v57  ;;  %v3739_v57 = vsub.s32 2, %v5518_v41  ;;  %v3727_v12 = vld [vmem:[%s6406_s6] sm:$0xf]  ;;  %s5256_s6 = smov [#allocation14]  }
 0x800   :  { %s4410_s24 = sshll.u32 %s5256_s6, 4  ;;  %s4411_s24 = int_to_ptr.vmem [resolvable:$true] %s4410_s24 }
 0x801   :  { %v5039_v56 = vpop.eup %5038  ;;  %v3667_v40 = vadd.f32 1e-05, %v3659_v31  ;;  %v3735_v31 = vsub.s32 1, %v5518_v41  ;;  %s5204_s25 = scalar_lea.vmem %s4411_s24, 512  ;;  %p5209_p1 = scmp.lt.s32.totalorder %s4411_s24, %s4411_s24 }
 0x802   :  { %v3673_v58 = vmul.f32 %v5039_v56, %v3661_v39  ;;  %v3743_v39 = vsub.s32 3, %v5518_v41  ;;  %v3732_v56 = vrot.slane %v3727_v12, %v3731_v18  ;;  %p5205_p0 = scmp.ne.s32.totalorder %s4411_s24, %s5204_s25  ;;  %p5210_p2 = scmp.lt.s32.totalorder %s5204_s25, %s5204_s25 }
 0x803   :  { %5044 = vrsqrt.f32 %v3667_v40  ;;  %v3740_v40 = vrot.slane %v3727_v12, %v3739_v57 }
 0x804   :  { %v3681_v13 = vmul.f32 %v4508_v35, %v3673_v58  ;;  %v3736_v58 = vrot.slane %v3727_v12, %v3735_v31  ;;  %p5211_p3 = por %p5210_p2, %p5209_p1 }
 0x805   :  { %v5041_v59 = vpop.eup %5040 }
 0x806   :  { %v3674_v61 = vmul.f32 %v5041_v59, %v3662_v62  ;;  %v3689_v29 = vadd.f32 %v4509_v22, %v3681_v13  ;;  %p5212_p4 = pnand %p5211_p3, %p5205_p0 }
 0x807   :  { %v5043_v54 = vpop.eup %5042 }
 0x808   :  { %v3682_v6 = vmul.f32 %v4508_v35, %v3674_v61  ;;  %v3676_v4 = vmul.f32 %v5043_v54, %v3664_v26 }
 0x80a   :  { %v3690_v52 = vadd.f32 %v4509_v22, %v3682_v6  ;;  %v3684_v5 = vmul.f32 %v4508_v35, %v3676_v4 }
 0x80c   :  { %v3693_v51 = vpack.c.bf16 %v3690_v52, %v3689_v29  ;;  %v3692_v48 = vadd.f32 %v4509_v22, %v3684_v5 }
 0x80d   :  { %v5045_v10 = vpop.eup %5044 }
 0x80e   :  { %3942 = vmatmul.mubr.bf16.vlgmr.msra.gmra.mrb[24].mxu1 %v3693_v51  ;;  %3995 = vmatmul.mubr.bf16.vlgmr.msra.gmra.mrb[24].mxu0 %v3693_v51  ;;  %v3675_v24 = vmul.f32 %v5045_v10, %v3663_v38 }
 0x80f   :  { %3951 = vmatprep.mubr.bf16.mxu1 %v5251_v30  ;;  %4004 = vmatprep.mubr.bf16.mxu0 %v5251_v30  ;;  %v4947_v30 = vld [vmem:[#allocation13 + $0xd8] sm:$0xff]  }
 0x810   :  { %v3683_v3 = vmul.f32 %v4508_v35, %v3675_v24  ;;  %4628 = vmatpush3.bf16.msra.mxu1 %v4936_v16  ;;  %4656 = vmatpush3.bf16.msra.mxu0 %v4937_v9  ;;  %v3744_v35 = vrot.slane %v3727_v12, %v3743_v39 }
 0x811   :  { %4629 = vmatprep.subr.bf16.mxu1 %v4938_v17  ;;  %4657 = vmatprep.subr.bf16.mxu0 %v4939_v27 }
 0x812   :  { %v3691_v25 = vadd.f32 %v4509_v22, %v3683_v3 }
 0x814   :  { %v3694_v0 = vpack.c.bf16 %v3692_v48, %v3691_v25  ;;  %4630 = vmatpush3.bf16.msra.mxu1 %v4940_v43  ;;  %4658 = vmatpush3.bf16.msra.mxu0 %v4941_v33 }
 0x815   :  { %4631 = vmatprep.subr.bf16.mxu1 %v4942_v45  ;;  %4659 = vmatprep.subr.bf16.mxu0 %v4943_v19 }
 0x816   :  { %3952 = vmatmul.mubr.bf16.gmra.mrb[28].mxu1 %v3694_v0  ;;  %4005 = vmatmul.mubr.bf16.gmra.mrb[28].mxu0 %v3694_v0 }
 0x818   :  { %4632 = vmatpush3.bf16.msra.mxu1 %v4944_v55  ;;  %4660 = vmatpush3.bf16.msra.mxu0 %v4945_v11 }
 0x819   :  { %4633 = vmatprep.subr.bf16.mxu1 %v4946_v8  ;;  %4661 = vmatprep.subr.bf16.mxu0 %v4947_v30 }
 0x81c   :  { %4634 = vmatpush3.bf16.msra.mxu1 %v4948_v21  ;;  %4662 = vmatpush3.bf16.msra.mxu0 %v4949_v46 }
 0x81d   :  { %4635 = vmatprep.subr.bf16.mxu1 %v4950_v7  ;;  %4663 = vmatprep.subr.bf16.mxu0 %v4951_v42 }
 0x820   :  { %4636 = vmatpush3.bf16.msra.mxu1 %v4952_v53  ;;  %4664 = vmatpush3.bf16.msra.mxu0 %v4953_v20 }
 0x821   :  { %4637 = vmatprep.subr.bf16.mxu1 %v4954_v50  ;;  %4665 = vmatprep.subr.bf16.mxu0 %v4955_v2 }
 0x824   :  { %4638 = vmatpush3.bf16.msra.mxu1 %v4956_v1  ;;  %4666 = vmatpush3.bf16.msra.mxu0 %v4957_v32 }
 0x825   :  { %4639 = vmatprep.subr.bf16.mxu1 %v4958_v37  ;;  %4667 = vmatprep.subr.bf16.mxu0 %v4959_v44 }
 0x828   :  { %4640 = vmatpush3.bf16.msra.mxu1 %v4960_v34  ;;  %4668 = vmatpush3.bf16.msra.mxu0 %v4961_v28 }
 0x829   :  { %4641 = vmatprep.subr.bf16.mxu1 %v4962_v47  ;;  %4669 = vmatprep.subr.bf16.mxu0 %v4963_v14 }
 0x82c   :  { %4642 = vmatpush3.bf16.msra.mxu1 %v4964_v60  ;;  %4670 = vmatpush3.bf16.msra.mxu0 %v4965_v23 }
 0x8e1   :  { %v3943_v62 = vpop.f32.mrb[24].mxu1  ;;  %v3996_v59 = vpop.f32.mrb[24].mxu0 }
 0x8e2   :  { %v3944_v61 = vadd.f32 %v3943_v62, %v3732_v56  ;;  %v3997_v13 = vadd.f32 %v3996_v59, %v3740_v40  ;;  %v3945_v54 = vpop.f32.mrb[25].mxu1  ;;  %v3998_v22 = vpop.f32.mrb[25].mxu0 }
 0x8e3   :  { %v3946_v26 = vadd.f32 %v3945_v54, %v3736_v58  ;;  %v3999_v6 = vadd.f32 %v3998_v22, %v3744_v35  ;;  %v3947_v29 = vpop.f32.mrb[26].mxu1  ;;  %v4000_v52 = vpop.f32.mrb[26].mxu0 }
 0x8e4   :  { %v3948_v4 = vadd.f32 %v3947_v29, %v3732_v56  ;;  %v4001_v38 = vadd.f32 %v4000_v52, %v3740_v40  ;;  %v3949_v51 = vpop.f32.mrb[27].mxu1  ;;  %v4002_v16 = vpop.f32.mrb[27].mxu0  ;;  %v4015_v10 = vmax.f32 %v3944_v61, 0.0  ;;  %v4017_v17 = vmax.f32 %v3997_v13, 0.0 }
 0x8e5   :  { %v3950_v9 = vadd.f32 %v3949_v51, %v3736_v58  ;;  %v4003_v41 = vadd.f32 %v4002_v16, %v3744_v35  ;;  %v4016_v5 = vmax.f32 %v3946_v26, 0.0  ;;  %v4018_v3 = vmax.f32 %v3999_v6, 0.0 }
 0x8e6   :  { %v4019_v27 = vmax.f32 %v3948_v4, 0.0  ;;  %v4021_v24 = vmax.f32 %v4001_v38, 0.0 }
 0x8e7   :  { %v4020_v43 = vmax.f32 %v3950_v9, 0.0  ;;  %v4022_v33 = vmax.f32 %v4003_v41, 0.0 }
 0x8e8   :  { %v4031_v45 = vpack.c.bf16 %v4019_v27, %v4015_v10  ;;  %v4033_v19 = vpack.c.bf16 %v4021_v24, %v4017_v17 }
 0x8e9   :  { %v4032_v25 = vpack.c.bf16 %v4020_v43, %v4016_v5  ;;  %v4034_v48 = vpack.c.bf16 %v4022_v33, %v4018_v3  ;;  %v3953_v0 = vpop.f32.mrb[28].mxu1  ;;  %v4006_v55 = vpop.f32.mrb[28].mxu0 }
 0x8ea   :  { %v3954_v11 = vadd.f32 %v3953_v0, %v3732_v56  ;;  %v4007_v8 = vadd.f32 %v4006_v55, %v3740_v40  ;;  %v3955_v30 = vpop.f32.mrb[29].mxu1  ;;  %v4008_v21 = vpop.f32.mrb[29].mxu0 }
 0x8eb   :  { %v3956_v46 = vadd.f32 %v3955_v30, %v3736_v58  ;;  %v4009_v7 = vadd.f32 %v4008_v21, %v3744_v35  ;;  %v3957_v42 = vpop.f32.mrb[30].mxu1  ;;  %v4010_v53 = vpop.f32.mrb[30].mxu0  ;;  %4331 = vmatprep.mubr.bf16.mxu1 %v4032_v25  ;;  %4380 = vmatprep.mubr.bf16.mxu0 %v4034_v48 }
 0x8ec   :  { %v3958_v20 = vadd.f32 %v3957_v42, %v3732_v56  ;;  %v4011_v50 = vadd.f32 %v4010_v53, %v3740_v40  ;;  %v3959_v2 = vpop.f32.mrb[31].mxu1  ;;  %v4012_v1 = vpop.f32.mrb[31].mxu0  ;;  %4332 = vmatmul.mubr.bf16.vlgmr.msra.gmra.mrb[32].mxu1 %v4031_v45  ;;  %4381 = vmatmul.mubr.bf16.vlgmr.msra.gmra.mrb[32].mxu0 %v4033_v19  ;;  %v4023_v44 = vmax.f32 %v3954_v11, 0.0  ;;  %v4025_v34 = vmax.f32 %v4007_v8, 0.0 }
 0x8ed   :  { %v3960_v32 = vadd.f32 %v3959_v2, %v3736_v58  ;;  %v4013_v37 = vadd.f32 %v4012_v1, %v3744_v35  ;;  %v4024_v14 = vmax.f32 %v3956_v46, 0.0  ;;  %v4026_v60 = vmax.f32 %v4009_v7, 0.0  ;;  %v4542_v58 = vld [vmem:[#allocation5 + $0x5] ss:$0 sm:$0xff] }
 0x8ee   :  { %v4027_v28 = vmax.f32 %v3958_v20, 0.0  ;;  %v4029_v47 = vmax.f32 %v4011_v50, 0.0 }
 0x8ef   :  { %v4028_v23 = vmax.f32 %v3960_v32, 0.0  ;;  %v4030_v18 = vmax.f32 %v4013_v37, 0.0 }
 0x8f0   :  { %v4035_v57 = vpack.c.bf16 %v4027_v28, %v4023_v44  ;;  %v4037_v12 = vpack.c.bf16 %v4029_v47, %v4025_v34 }
 0x8f1   :  { %v4036_v31 = vpack.c.bf16 %v4028_v23, %v4024_v14  ;;  %v4038_v39 = vpack.c.bf16 %v4030_v18, %v4026_v60 }
 0x8f3   :  { %4339 = vmatprep.mubr.bf16.mxu1 %v4036_v31  ;;  %4388 = vmatprep.mubr.bf16.mxu0 %v4038_v39 }
 0x8f4   :  { %4340 = vmatmul.mubr.bf16.gmra.mrb[36].mxu1 %v4035_v57  ;;  %4389 = vmatmul.mubr.bf16.gmra.mrb[36].mxu0 %v4037_v12 }
 0x9bf   :  { %v4643_v56 = vpop.f32.mrb[32].mxu1  ;;  %v4671_v40 = vpop.f32.mrb[32].mxu0 }
 0x9c0   :  { %v4644_v35 = vpop.f32.mrb[33].mxu1  ;;  %v4672_v62 = vpop.f32.mrb[33].mxu0 }
 0x9c1   :  { %v4645_v59 = vadd.f32 %v4644_v35, %v4643_v56  ;;  %v4673_v61 = vadd.f32 %v4672_v62, %v4671_v40  ;;  %v4646_v13 = vpop.f32.mrb[34].mxu1  ;;  %v4674_v54 = vpop.f32.mrb[34].mxu0 }
 0x9c2   :  { %v4647_v22 = vpop.f32.mrb[35].mxu1  ;;  %v4675_v26 = vpop.f32.mrb[35].mxu0 }
 0x9c3   :  { %v4334_v6 = vadd.f32 %v4645_v59, %v4542_v58  ;;  %v4648_v29 = vadd.f32 %v4647_v22, %v4646_v13  ;;  %v4676_v52 = vadd.f32 %v4675_v26, %v4674_v54 }
 0x9c5   :  { %v4383_v4 = vadd.f32 %v4673_v61, %v4334_v6  ;;  %v4337_v38 = vadd.f32 %v4648_v29, %v4542_v58 }
 0x9c7   :  { %v4397_v51 = vadd.f32 %v4383_v4, %v6348_v63  ;;  %v4386_v16 = vadd.f32 %v4676_v52, %v4337_v38  ;;  %v4649_v9 = vpop.f32.mrb[36].mxu1  ;;  %v4677_v41 = vpop.f32.mrb[36].mxu0 }
 0x9c8   :  { %v4650_v10 = vpop.f32.mrb[37].mxu1  ;;  %v4678_v17 = vpop.f32.mrb[37].mxu0 }
 0x9c9   :  { %4401 = vst [vmem:[#allocation14] sm:$0xff] %v4397_v51  ;;  %v4398_v27 = vadd.f32 %v4386_v16, %v6350_v49  ;;  %v4651_v24 = vadd.f32 %v4650_v10, %v4649_v9  ;;  %v4679_v5 = vadd.f32 %v4678_v17, %v4677_v41  ;;  %v4652_v3 = vpop.f32.mrb[38].mxu1  ;;  %v4680_v43 = vpop.f32.mrb[38].mxu0 }
 0x9ca   :  { %v4653_v33 = vpop.f32.mrb[39].mxu1  ;;  %v4681_v45 = vpop.f32.mrb[39].mxu0 }
 0x9cb   :  { %4402 = vst [vmem:[#allocation14 + $0x8] sm:$0xff] %v4398_v27  ;;  %v4342_v19 = vadd.f32 %v4651_v24, %v4542_v58  ;;  %v4654_v25 = vadd.f32 %v4653_v33, %v4652_v3  ;;  %v4682_v48 = vadd.f32 %v4681_v45, %v4680_v43 }
 0x9cd   :  { %v4391_v0 = vadd.f32 %v4679_v5, %v4342_v19  ;;  %v4345_v63 = vadd.f32 %v4654_v25, %v4542_v58 }
 0x9cf   :  { %v4399_v55 = vadd.f32 %v4391_v0, %v6363_v36  ;;  %v4394_v11 = vadd.f32 %v4682_v48, %v4345_v63 }
 0x9d1   :  { %4403 = vst [vmem:[#allocation14 + $0x10] sm:$0xff] %v4399_v55  ;;  %v4400_v49 = vadd.f32 %v4394_v11, %v6356_v15 }
 0x9d3   :  { %4404 = vst [vmem:[#allocation14 + $0x18] sm:$0xff] %v4400_v49 }
 0x9d4   :  { %5215 = shalt.err (!%p5212_p4)
}
 0x9d5   :  { %s5216_s27 = scalar_lea.hbm %s6408_s8, 512 }
 0x9d6   :  { %p5217_p5 = scmp.ne.s32.totalorder %s6408_s8, %s5216_s27  ;;  %p5220_p6 = scmp.lt.u32.totalorder %s5216_s27, %s6408_s8 }
 0x9d8   :  { %p5222_p7 = pnand %p5220_p6, %p5217_p5 }
 0x9da   :  { %5225 = shalt.err (!%p5222_p7)
}
 0x9db   :  { %4416 = dma.vmem_to_hbm [thread:$0]  %s4411_s24, 512, %s6408_s8, [#allocation4], %s5244_s5, %s5244_s5, %s5245_s9  }
 0x9dc   :  { %5234 = dma.done.wait [#allocation4], 512  }
 0x9dd   :  { %5235 = vsyncadd [#allocation4], 4294966784 }
 0x9de   :  { %4420 = vsyncpa [#allocation3], 1 }
 0x9df   :  { %4421 = vsyncpa [#allocation6], 1 }
 0x9e0   :  { %4422 = vsyncpa [#allocation9], 1 }
 0x9e1   :  { %4423 = vsyncpa [#allocation12], 1 }
 0x9e2   :  { %4424 = vsyncpa [#allocation4], 1 }

</bundles_post_ra>
